<compile_context>
chip_gen: v6e
topology: v6e:2x2x1
jax: 0.10.0
libtpu: 0.0.40
codegen_flags: <defaults>
</compile_context>

<pallas_src>
import jax
import jax.numpy as jnp
from jax.experimental import pallas as pl
from jax.experimental.pallas import tpu as pltpu

# Problem sizes (small, consistent with the module's forward).
N_NODES = 8          # total nodes across all graphs (data.x rows)
N_GRAPHS = 2         # number of graphs in the batch (data.batch.max() + 1)
N_PAD = 128          # lane-dense padded node count
FEAT = 64            # Set2Set in_channels
HID = FEAT           # LSTM hidden size
GATES = 4 * HID      # 256
DIM_MLP = 256        # linear1 output
PROJ_DIM = 32        # projection_dim
OUT_PAD = 128        # lane-dense padded output width
STEPS = 5            # Set2Set processing steps
GB = N_GRAPHS        # graphs per grid block (use 128-256 for real batches)
W_ROWS = 2 * HID + 2 * HID + DIM_MLP   # 512 rows in the packed weight slab


def _set2set_mlp_kernel(xt_ref, xp_ref, maskb_ref, w_ref, bias_ref, out_ref):
    x_t = xt_ref[...]                       # [FEAT, N_PAD] f32, transposed zero-padded x
    x_p = xp_ref[...]                       # [N_PAD, FEAT] f32, zero-padded x
    mask_bias = maskb_ref[...]              # [GB, N_PAD]   f32 (0 member / -1e30 not)

    w = w_ref[...]                          # [512, 256] f32 packed weight slab
    w_gate = w[0:2 * HID, :]                # [128, 256] fused LSTM gates (q_star = [h|r])
    w_lin1 = w[2 * HID:4 * HID, :]          # [128, 256] linear1
    w_proj = w[4 * HID:, :OUT_PAD]          # [256, 128] projector (cols >= 32 are zero)

    b = bias_ref[...]                       # [3, 256] f32
    # Hoisted broadcast: the unrolled step loop reuses this single broadcast_in_dim.
    b_gate = jnp.broadcast_to(b[0:1, :], (GB, GATES))
    b_lin1 = b[1:2, :]
    b_proj = b[2:3, :OUT_PAD]

    c = jnp.zeros((GB, HID), jnp.float32)
    q_star = jnp.zeros((GB, 2 * HID), jnp.float32)

    for _ in range(STEPS):
        # Fused LSTM cell: q_star == [h | r], w_hh folded into the h-rows of w_gate,
        # both biases pre-added host-side -> a single [GB,128]@[128,256] MXU matmul.
        gates = jnp.dot(q_star, w_gate, preferred_element_type=jnp.float32) + b_gate

        # Single EUP pass: i/f/o columns were pre-scaled by 0.5 host-side, so
        # sigmoid(z) = 0.5*tanh(z/2) + 0.5 is recovered with one VALU affine.
        t = jnp.tanh(gates)                                  # [GB, 256]
        sig = 0.5 * t + 0.5
        i_g = sig[:, 0 * HID:1 * HID]
        f_g = sig[:, 1 * HID:2 * HID]
        o_g = sig[:, 2 * HID:3 * HID]
        g_g = t[:, 3 * HID:4 * HID]
        c = f_g * c + i_g * g_g
        h = o_g * jnp.tanh(c)                                # q == h

        # Segment (per-graph) attention over nodes; lane-dense [GB, 128] logits,
        # no transposed operand on the critical path.
        e = jnp.dot(h, x_t, preferred_element_type=jnp.float32) + mask_bias
        m = jnp.max(e, axis=-1, keepdims=True)
        p = jnp.exp(e - m)                                   # masked/pad lanes -> 0
        s = jnp.sum(p, axis=-1, keepdims=True)
        # TODO(synk): a graph with zero member nodes would make this a uniform average
        # over non-member nodes (PyG would also misbehave); not reachable here.
        r = jnp.dot(p, x_p, preferred_element_type=jnp.float32) / s   # exact division
        q_star = jnp.concatenate([h, r], axis=-1)            # [GB, 128]

    # linear1 -> ReLU -> projector (single K=128 and K=256 matmuls).
    hdn = jnp.maximum(
        jnp.dot(q_star, w_lin1, preferred_element_type=jnp.float32) + b_lin1, 0.0)
    out = jnp.dot(hdn, w_proj, preferred_element_type=jnp.float32) + b_proj
    out_ref[...] = out.astype(out_ref.dtype)                 # [GB, 128] lane-dense store


def _reorder_scale_gates(w):
    # torch gate order [i, f, g, o] -> kernel order [i, f, o, g]; scale i/f/o by 0.5
    # so one tanh pass recovers sigmoid(z) = 0.5*tanh(z/2) + 0.5.
    i = w[..., 0 * HID:1 * HID]
    f = w[..., 1 * HID:2 * HID]
    g = w[..., 2 * HID:3 * HID]
    o = w[..., 3 * HID:4 * HID]
    return jnp.concatenate([0.5 * i, 0.5 * f, 0.5 * o, g], axis=-1)


def pack_params(params):
    """Params-only packing; call ONCE (does not depend on x/batch)."""
    # q_star == [h | r]  =>  gates = h @ (w_ih[:64] + w_hh) + r @ w_ih[64:] + (b_ih + b_hh)
    wg = jnp.concatenate([params["w_ih_t"][:HID, :] + params["w_hh_t"],
                          params["w_ih_t"][HID:, :]], axis=0)          # [128, 256]
    wg = _reorder_scale_gates(wg)
    w1 = params["w1_t"]                                                # [128, 256]
    w2p = jnp.zeros((DIM_MLP, GATES), jnp.float32).at[:, :PROJ_DIM].set(params["w2_t"])
    w_slab = jnp.concatenate([wg, w1, w2p], axis=0).astype(jnp.float32)  # [512, 256]

    b_gate = _reorder_scale_gates((params["b_ih"] + params["b_hh"])[None, :])
    b1 = params["b1"][None, :]
    b2 = jnp.zeros((1, GATES), jnp.float32).at[0, :PROJ_DIM].set(params["b2"])
    bias_slab = jnp.concatenate([b_gate, b1, b2], axis=0).astype(jnp.float32)  # [3, 256]
    return w_slab, bias_slab


def pack_inputs(x, batch):
    """Per-call packing: lane-padded node features (both layouts) and mask bias."""
    n = x.shape[0]
    x_pad = jnp.zeros((N_PAD, FEAT), jnp.float32).at[:n, :].set(x.astype(jnp.float32))
    x_t = x_pad.T                                                        # [64, 128]
    member = jnp.zeros((N_GRAPHS, N_PAD), jnp.bool_).at[:, :n].set(
        jnp.arange(N_GRAPHS, dtype=jnp.int32)[:, None] == batch.astype(jnp.int32)[None, :])
    mask_bias = jnp.where(member, 0.0, -1e30).astype(jnp.float32)        # [B, 128]
    return x_t, x_pad, mask_bias


def gcn_set2set_forward(x, batch, packed_params):
    """x: [N, 64] f32 node features; batch: [N] int graph ids; packed_params from pack_params."""
    w_slab, bias_slab = packed_params
    x_t, x_pad, mask_bias = pack_inputs(x, batch)

    per_step = (2 * N_GRAPHS * (2 * HID) * GATES      # gate matmul
                + 2 * N_GRAPHS * HID * N_PAD          # attention logits
                + 2 * N_GRAPHS * N_PAD * HID)         # readout r
    tail = 2 * N_GRAPHS * (2 * HID) * DIM_MLP + 2 * N_GRAPHS * DIM_MLP * OUT_PAD
    flops = STEPS * per_step + tail
    transcendentals = STEPS * N_GRAPHS * (GATES + HID + N_PAD)
    bytes_accessed = 4 * (FEAT * N_PAD + N_PAD * FEAT + N_GRAPHS * N_PAD
                          + W_ROWS * GATES + 3 * GATES + N_GRAPHS * OUT_PAD)

    out_pad = pl.pallas_call(
        _set2set_mlp_kernel,
        out_shape=jax.ShapeDtypeStruct((N_GRAPHS, OUT_PAD), jnp.float32),
        grid=(pl.cdiv(N_GRAPHS, GB),),
        in_specs=[
            pl.BlockSpec((FEAT, N_PAD), lambda i: (0, 0)),     # x_t   (shared across blocks)
            pl.BlockSpec((N_PAD, FEAT), lambda i: (0, 0)),     # x_pad (shared across blocks)
            pl.BlockSpec((GB, N_PAD), lambda i: (i, 0)),       # mask_bias, blocked over graphs
            pl.BlockSpec((W_ROWS, GATES), lambda i: (0, 0)),   # weight slab
            pl.BlockSpec((3, GATES), lambda i: (0, 0)),        # bias slab
        ],
        out_specs=pl.BlockSpec((GB, OUT_PAD), lambda i: (i, 0)),
        compiler_params=pltpu.CompilerParams(dimension_semantics=("parallel",)),
        cost_estimate=pl.CostEstimate(flops=flops, transcendentals=transcendentals,
                                      bytes_accessed=bytes_accessed),
    )(x_t, x_pad, mask_bias, w_slab, bias_slab)
    return out_pad[:, :PROJ_DIM]


def _reference_forward(x, batch, params):
    """Pure-JAX f32 reference: raw params, torch gate order, unfused q_star path."""
    hi = jax.lax.Precision.HIGHEST
    member = (jnp.arange(N_GRAPHS)[:, None] == batch[None, :])
    h = jnp.zeros((N_GRAPHS, HID), jnp.float32)
    c = jnp.zeros((N_GRAPHS, HID), jnp.float32)
    q_star = jnp.zeros((N_GRAPHS, 2 * FEAT), jnp.float32)
    bias = (params["b_ih"] + params["b_hh"])[None, :]
    for _ in range(STEPS):
        gates = (jnp.dot(q_star, params["w_ih_t"], precision=hi)
                 + jnp.dot(h, params["w_hh_t"], precision=hi) + bias)
        i_g = jax.nn.sigmoid(gates[:, 0 * HID:1 * HID])
        f_g = jax.nn.sigmoid(gates[:, 1 * HID:2 * HID])
        g_g = jnp.tanh(gates[:, 2 * HID:3 * HID])
        o_g = jax.nn.sigmoid(gates[:, 3 * HID:4 * HID])
        c = f_g * c + i_g * g_g
        h = o_g * jnp.tanh(c)
        e = jnp.dot(h, x.T, precision=hi)
        e = jnp.where(member, e, -jnp.inf)
        p = jnp.where(member, jnp.exp(e - jnp.max(e, axis=-1, keepdims=True)), 0.0)
        a = p / jnp.sum(p, axis=-1, keepdims=True)
        r = jnp.dot(a, x, precision=hi)
        q_star = jnp.concatenate([h, r], axis=-1)
    hdn = jnp.maximum(jnp.dot(q_star, params["w1_t"], precision=hi)
                      + params["b1"][None, :], 0.0)
    return jnp.dot(hdn, params["w2_t"], precision=hi) + params["b2"][None, :]


def init_params(key):
    ks = jax.random.split(key, 8)
    s = 0.1
    # nn.LSTM(input_size=128, hidden_size=64); stored pre-transposed so row-vector @ matrix
    # keeps the contraction dim on lanes. Gate order along the 256 axis: i, f, g, o.
    w_ih_t = jax.random.normal(ks[0], (2 * FEAT, GATES), jnp.float32) * s
    w_hh_t = jax.random.normal(ks[1], (HID, GATES), jnp.float32) * s
    b_ih = jax.random.normal(ks[2], (GATES,), jnp.float32) * s
    b_hh = jax.random.normal(ks[3], (GATES,), jnp.float32) * s
    # linear1: 128 -> 256 ; projector linear: 256 -> projection_dim
    w1_t = jax.random.normal(ks[4], (2 * FEAT, DIM_MLP), jnp.float32) * s
    b1 = jax.random.normal(ks[5], (DIM_MLP,), jnp.float32) * s
    w2_t = jax.random.normal(ks[6], (DIM_MLP, PROJ_DIM), jnp.float32) * s
    b2 = jax.random.normal(ks[7], (PROJ_DIM,), jnp.float32) * s
    return dict(w_ih_t=w_ih_t, w_hh_t=w_hh_t, b_ih=b_ih, b_hh=b_hh,
                w1_t=w1_t, b1=b1, w2_t=w2_t, b2=b2)


if __name__ == "__main__":
    key = jax.random.PRNGKey(0)
    k_x, k_p = jax.random.split(key)

    # data.x: [N, 64] node features; data.batch: graph id per node (sorted, as in PyG).
    x = jax.random.normal(k_x, (N_NODES, FEAT), jnp.float32)
    batch = jnp.array([0, 0, 0, 0, 1, 1, 1, 1], jnp.int32)
    params = init_params(k_p)

    packed = pack_params(params)            # params-only packing, done once (cached)
    out = jax.block_until_ready(gcn_set2set_forward(x, batch, packed))
    ref = jax.block_until_ready(_reference_forward(x, batch, params))

    assert out.shape == (N_GRAPHS, PROJ_DIM)
    max_err = float(jnp.max(jnp.abs(out - ref)))
    assert jnp.allclose(out, ref, rtol=2e-2, atol=2e-2), \
        f"kernel/reference mismatch (max abs err {max_err})"

    print("KERNEL_OK")
</pallas_src>

<mosaic_0001>
module attributes {stable_mosaic.version = 11 : i64} {
  func.func @_set2set_mlp_kernel(%arg0: i32, %arg1: memref<64x128xf32, #tpu.memory_space<vmem>>, %arg2: memref<128x64xf32, #tpu.memory_space<vmem>>, %arg3: memref<2x128xf32, #tpu.memory_space<vmem>>, %arg4: memref<512x256xf32, #tpu.memory_space<vmem>>, %arg5: memref<3x256xf32, #tpu.memory_space<vmem>>, %arg6: memref<2x128xf32, #tpu.memory_space<vmem>>) attributes {dimension_semantics = [#tpu.dimension_semantics<parallel>], iteration_bounds = array<i64: 1>, scalar_prefetch = 0 : i64, scratch_operands = 0 : i64, tpu.core_type = #tpu.core_type<tc>, window_params = [{pipeline_mode = #tpu.pipeline_mode<synchronous>, transform_indices = @transform_0, window_bounds = array<i64: 64, 128>}, {pipeline_mode = #tpu.pipeline_mode<synchronous>, transform_indices = @transform_1, window_bounds = array<i64: 128, 64>}, {transform_indices = @transform_2, window_bounds = array<i64: 2, 128>}, {pipeline_mode = #tpu.pipeline_mode<synchronous>, transform_indices = @transform_3, window_bounds = array<i64: 512, 256>}, {pipeline_mode = #tpu.pipeline_mode<synchronous>, transform_indices = @transform_4, window_bounds = array<i64: 3, 256>}, {transform_indices = @transform_5, window_bounds = array<i64: 2, 128>}]} {
    %c0 = arith.constant 0 : index
    %c0_0 = arith.constant 0 : index
    %0 = vector.load %arg1[%c0, %c0_0] : memref<64x128xf32, #tpu.memory_space<vmem>>, vector<64x128xf32>
    %c0_1 = arith.constant 0 : index
    %c0_2 = arith.constant 0 : index
    %1 = vector.load %arg2[%c0_1, %c0_2] : memref<128x64xf32, #tpu.memory_space<vmem>>, vector<128x64xf32>
    %c0_3 = arith.constant 0 : index
    %c0_4 = arith.constant 0 : index
    %2 = vector.load %arg3[%c0_3, %c0_4] : memref<2x128xf32, #tpu.memory_space<vmem>>, vector<2x128xf32>
    %c0_5 = arith.constant 0 : index
    %c0_6 = arith.constant 0 : index
    %3 = vector.load %arg4[%c0_5, %c0_6] : memref<512x256xf32, #tpu.memory_space<vmem>>, vector<512x256xf32>
    %4 = vector.extract_strided_slice %3 {offsets = [0, 0], sizes = [128, 256], strides = [1, 1]} : vector<512x256xf32> to vector<128x256xf32>
    %5 = vector.extract_strided_slice %3 {offsets = [128, 0], sizes = [128, 256], strides = [1, 1]} : vector<512x256xf32> to vector<128x256xf32>
    %6 = vector.extract_strided_slice %3 {offsets = [256, 0], sizes = [256, 128], strides = [1, 1]} : vector<512x256xf32> to vector<256x128xf32>
    %c0_7 = arith.constant 0 : index
    %c0_8 = arith.constant 0 : index
    %7 = vector.load %arg5[%c0_7, %c0_8] : memref<3x256xf32, #tpu.memory_space<vmem>>, vector<3x256xf32>
    %8 = vector.extract_strided_slice %7 {offsets = [0, 0], sizes = [1, 256], strides = [1, 1]} : vector<3x256xf32> to vector<1x256xf32>
    %9 = vector.shape_cast %8 : vector<1x256xf32> to vector<1x256xf32>
    %10 = vector.broadcast %9 : vector<1x256xf32> to vector<2x256xf32>
    %11 = vector.extract_strided_slice %7 {offsets = [1, 0], sizes = [1, 256], strides = [1, 1]} : vector<3x256xf32> to vector<1x256xf32>
    %12 = vector.extract_strided_slice %7 {offsets = [2, 0], sizes = [1, 128], strides = [1, 1]} : vector<3x256xf32> to vector<1x128xf32>
    %cst = arith.constant 0.000000e+00 : f32
    %13 = vector.broadcast %cst : f32 to vector<2x64xf32>
    %cst_9 = arith.constant 0.000000e+00 : f32
    %14 = vector.broadcast %cst_9 : f32 to vector<2x128xf32>
    %cst_10 = arith.constant dense<0.000000e+00> : vector<2x256xf32>
    %15 = tpu.matmul %14, %4, %cst_10 {dimension_numbers = #tpu.dot_dimension_numbers<[1], [0], [0], [1], [0, 0, 1, 1], [], []>} : vector<2x128xf32>, vector<128x256xf32>, vector<2x256xf32> -> vector<2x256xf32>
    %16 = arith.addf %15, %10 : vector<2x256xf32>
    %17 = math.tanh %16 : vector<2x256xf32>
    %cst_11 = arith.constant 5.000000e-01 : f32
    %18 = vector.broadcast %cst_11 : f32 to vector<2x256xf32>
    %19 = arith.mulf %18, %17 : vector<2x256xf32>
    %cst_12 = arith.constant 5.000000e-01 : f32
    %20 = vector.broadcast %cst_12 : f32 to vector<2x256xf32>
    %21 = arith.addf %19, %20 : vector<2x256xf32>
    %22 = vector.extract_strided_slice %21 {offsets = [0, 0], sizes = [2, 64], strides = [1, 1]} : vector<2x256xf32> to vector<2x64xf32>
    %23 = vector.extract_strided_slice %21 {offsets = [0, 64], sizes = [2, 64], strides = [1, 1]} : vector<2x256xf32> to vector<2x64xf32>
    %24 = vector.extract_strided_slice %21 {offsets = [0, 128], sizes = [2, 64], strides = [1, 1]} : vector<2x256xf32> to vector<2x64xf32>
    %25 = vector.extract_strided_slice %17 {offsets = [0, 192], sizes = [2, 64], strides = [1, 1]} : vector<2x256xf32> to vector<2x64xf32>
    %26 = arith.mulf %23, %13 : vector<2x64xf32>
    %27 = arith.mulf %22, %25 : vector<2x64xf32>
    %28 = arith.addf %26, %27 : vector<2x64xf32>
    %29 = math.tanh %28 : vector<2x64xf32>
    %30 = arith.mulf %24, %29 : vector<2x64xf32>
    %cst_13 = arith.constant dense<0.000000e+00> : vector<2x128xf32>
    %31 = tpu.matmul %30, %0, %cst_13 {dimension_numbers = #tpu.dot_dimension_numbers<[1], [0], [0], [1], [0, 0, 1, 1], [], []>} : vector<2x64xf32>, vector<64x128xf32>, vector<2x128xf32> -> vector<2x128xf32>
    %32 = arith.addf %31, %2 : vector<2x128xf32>
    %cst_14 = arith.constant dense<0xFF800000> : vector<2xf32>
    %33 = vector.multi_reduction <maximumf>, %32, %cst_14 [1] : vector<2x128xf32> to vector<2xf32>
    %34 = vector.shape_cast %33 : vector<2xf32> to vector<2x1xf32>
    %35 = vector.broadcast %34 : vector<2x1xf32> to vector<2x128xf32>
    %36 = arith.subf %32, %35 : vector<2x128xf32>
    %37 = math.exp %36 : vector<2x128xf32>
    %cst_15 = arith.constant dense<0.000000e+00> : vector<2xf32>
    %38 = vector.multi_reduction <add>, %37, %cst_15 [1] : vector<2x128xf32> to vector<2xf32>
    %39 = vector.shape_cast %38 : vector<2xf32> to vector<2x1xf32>
    %cst_16 = arith.constant dense<0.000000e+00> : vector<2x64xf32>
    %40 = tpu.matmul %37, %1, %cst_16 {dimension_numbers = #tpu.dot_dimension_numbers<[1], [0], [0], [1], [0, 0, 1, 1], [], []>} : vector<2x128xf32>, vector<128x64xf32>, vector<2x64xf32> -> vector<2x64xf32>
    %41 = vector.broadcast %39 : vector<2x1xf32> to vector<2x64xf32>
    %42 = arith.divf %40, %41 : vector<2x64xf32>
    %43 = tpu.concatenate %30, %42 in 1 : vector<2x64xf32>, vector<2x64xf32> -> vector<2x128xf32>
    %cst_17 = arith.constant dense<0.000000e+00> : vector<2x256xf32>
    %44 = tpu.matmul %43, %4, %cst_17 {dimension_numbers = #tpu.dot_dimension_numbers<[1], [0], [0], [1], [0, 0, 1, 1], [], []>} : vector<2x128xf32>, vector<128x256xf32>, vector<2x256xf32> -> vector<2x256xf32>
    %45 = arith.addf %44, %10 : vector<2x256xf32>
    %46 = math.tanh %45 : vector<2x256xf32>
    %cst_18 = arith.constant 5.000000e-01 : f32
    %47 = vector.broadcast %cst_18 : f32 to vector<2x256xf32>
    %48 = arith.mulf %47, %46 : vector<2x256xf32>
    %cst_19 = arith.constant 5.000000e-01 : f32
    %49 = vector.broadcast %cst_19 : f32 to vector<2x256xf32>
    %50 = arith.addf %48, %49 : vector<2x256xf32>
    %51 = vector.extract_strided_slice %50 {offsets = [0, 0], sizes = [2, 64], strides = [1, 1]} : vector<2x256xf32> to vector<2x64xf32>
    %52 = vector.extract_strided_slice %50 {offsets = [0, 64], sizes = [2, 64], strides = [1, 1]} : vector<2x256xf32> to vector<2x64xf32>
    %53 = vector.extract_strided_slice %50 {offsets = [0, 128], sizes = [2, 64], strides = [1, 1]} : vector<2x256xf32> to vector<2x64xf32>
    %54 = vector.extract_strided_slice %46 {offsets = [0, 192], sizes = [2, 64], strides = [1, 1]} : vector<2x256xf32> to vector<2x64xf32>
    %55 = arith.mulf %52, %28 : vector<2x64xf32>
    %56 = arith.mulf %51, %54 : vector<2x64xf32>
    %57 = arith.addf %55, %56 : vector<2x64xf32>
    %58 = math.tanh %57 : vector<2x64xf32>
    %59 = arith.mulf %53, %58 : vector<2x64xf32>
    %cst_20 = arith.constant dense<0.000000e+00> : vector<2x128xf32>
    %60 = tpu.matmul %59, %0, %cst_20 {dimension_numbers = #tpu.dot_dimension_numbers<[1], [0], [0], [1], [0, 0, 1, 1], [], []>} : vector<2x64xf32>, vector<64x128xf32>, vector<2x128xf32> -> vector<2x128xf32>
    %61 = arith.addf %60, %2 : vector<2x128xf32>
    %cst_21 = arith.constant dense<0xFF800000> : vector<2xf32>
    %62 = vector.multi_reduction <maximumf>, %61, %cst_21 [1] : vector<2x128xf32> to vector<2xf32>
    %63 = vector.shape_cast %62 : vector<2xf32> to vector<2x1xf32>
    %64 = vector.broadcast %63 : vector<2x1xf32> to vector<2x128xf32>
    %65 = arith.subf %61, %64 : vector<2x128xf32>
    %66 = math.exp %65 : vector<2x128xf32>
    %cst_22 = arith.constant dense<0.000000e+00> : vector<2xf32>
    %67 = vector.multi_reduction <add>, %66, %cst_22 [1] : vector<2x128xf32> to vector<2xf32>
    %68 = vector.shape_cast %67 : vector<2xf32> to vector<2x1xf32>
    %cst_23 = arith.constant dense<0.000000e+00> : vector<2x64xf32>
    %69 = tpu.matmul %66, %1, %cst_23 {dimension_numbers = #tpu.dot_dimension_numbers<[1], [0], [0], [1], [0, 0, 1, 1], [], []>} : vector<2x128xf32>, vector<128x64xf32>, vector<2x64xf32> -> vector<2x64xf32>
    %70 = vector.broadcast %68 : vector<2x1xf32> to vector<2x64xf32>
    %71 = arith.divf %69, %70 : vector<2x64xf32>
    %72 = tpu.concatenate %59, %71 in 1 : vector<2x64xf32>, vector<2x64xf32> -> vector<2x128xf32>
    %cst_24 = arith.constant dense<0.000000e+00> : vector<2x256xf32>
    %73 = tpu.matmul %72, %4, %cst_24 {dimension_numbers = #tpu.dot_dimension_numbers<[1], [0], [0], [1], [0, 0, 1, 1], [], []>} : vector<2x128xf32>, vector<128x256xf32>, vector<2x256xf32> -> vector<2x256xf32>
    %74 = arith.addf %73, %10 : vector<2x256xf32>
    %75 = math.tanh %74 : vector<2x256xf32>
    %cst_25 = arith.constant 5.000000e-01 : f32
    %76 = vector.broadcast %cst_25 : f32 to vector<2x256xf32>
    %77 = arith.mulf %76, %75 : vector<2x256xf32>
    %cst_26 = arith.constant 5.000000e-01 : f32
    %78 = vector.broadcast %cst_26 : f32 to vector<2x256xf32>
    %79 = arith.addf %77, %78 : vector<2x256xf32>
    %80 = vector.extract_strided_slice %79 {offsets = [0, 0], sizes = [2, 64], strides = [1, 1]} : vector<2x256xf32> to vector<2x64xf32>
    %81 = vector.extract_strided_slice %79 {offsets = [0, 64], sizes = [2, 64], strides = [1, 1]} : vector<2x256xf32> to vector<2x64xf32>
    %82 = vector.extract_strided_slice %79 {offsets = [0, 128], sizes = [2, 64], strides = [1, 1]} : vector<2x256xf32> to vector<2x64xf32>
    %83 = vector.extract_strided_slice %75 {offsets = [0, 192], sizes = [2, 64], strides = [1, 1]} : vector<2x256xf32> to vector<2x64xf32>
    %84 = arith.mulf %81, %57 : vector<2x64xf32>
    %85 = arith.mulf %80, %83 : vector<2x64xf32>
    %86 = arith.addf %84, %85 : vector<2x64xf32>
    %87 = math.tanh %86 : vector<2x64xf32>
    %88 = arith.mulf %82, %87 : vector<2x64xf32>
    %cst_27 = arith.constant dense<0.000000e+00> : vector<2x128xf32>
    %89 = tpu.matmul %88, %0, %cst_27 {dimension_numbers = #tpu.dot_dimension_numbers<[1], [0], [0], [1], [0, 0, 1, 1], [], []>} : vector<2x64xf32>, vector<64x128xf32>, vector<2x128xf32> -> vector<2x128xf32>
    %90 = arith.addf %89, %2 : vector<2x128xf32>
    %cst_28 = arith.constant dense<0xFF800000> : vector<2xf32>
    %91 = vector.multi_reduction <maximumf>, %90, %cst_28 [1] : vector<2x128xf32> to vector<2xf32>
    %92 = vector.shape_cast %91 : vector<2xf32> to vector<2x1xf32>
    %93 = vector.broadcast %92 : vector<2x1xf32> to vector<2x128xf32>
    %94 = arith.subf %90, %93 : vector<2x128xf32>
    %95 = math.exp %94 : vector<2x128xf32>
    %cst_29 = arith.constant dense<0.000000e+00> : vector<2xf32>
    %96 = vector.multi_reduction <add>, %95, %cst_29 [1] : vector<2x128xf32> to vector<2xf32>
    %97 = vector.shape_cast %96 : vector<2xf32> to vector<2x1xf32>
    %cst_30 = arith.constant dense<0.000000e+00> : vector<2x64xf32>
    %98 = tpu.matmul %95, %1, %cst_30 {dimension_numbers = #tpu.dot_dimension_numbers<[1], [0], [0], [1], [0, 0, 1, 1], [], []>} : vector<2x128xf32>, vector<128x64xf32>, vector<2x64xf32> -> vector<2x64xf32>
    %99 = vector.broadcast %97 : vector<2x1xf32> to vector<2x64xf32>
    %100 = arith.divf %98, %99 : vector<2x64xf32>
    %101 = tpu.concatenate %88, %100 in 1 : vector<2x64xf32>, vector<2x64xf32> -> vector<2x128xf32>
    %cst_31 = arith.constant dense<0.000000e+00> : vector<2x256xf32>
    %102 = tpu.matmul %101, %4, %cst_31 {dimension_numbers = #tpu.dot_dimension_numbers<[1], [0], [0], [1], [0, 0, 1, 1], [], []>} : vector<2x128xf32>, vector<128x256xf32>, vector<2x256xf32> -> vector<2x256xf32>
    %103 = arith.addf %102, %10 : vector<2x256xf32>
    %104 = math.tanh %103 : vector<2x256xf32>
    %cst_32 = arith.constant 5.000000e-01 : f32
    %105 = vector.broadcast %cst_32 : f32 to vector<2x256xf32>
    %106 = arith.mulf %105, %104 : vector<2x256xf32>
    %cst_33 = arith.constant 5.000000e-01 : f32
    %107 = vector.broadcast %cst_33 : f32 to vector<2x256xf32>
    %108 = arith.addf %106, %107 : vector<2x256xf32>
    %109 = vector.extract_strided_slice %108 {offsets = [0, 0], sizes = [2, 64], strides = [1, 1]} : vector<2x256xf32> to vector<2x64xf32>
    %110 = vector.extract_strided_slice %108 {offsets = [0, 64], sizes = [2, 64], strides = [1, 1]} : vector<2x256xf32> to vector<2x64xf32>
    %111 = vector.extract_strided_slice %108 {offsets = [0, 128], sizes = [2, 64], strides = [1, 1]} : vector<2x256xf32> to vector<2x64xf32>
    %112 = vector.extract_strided_slice %104 {offsets = [0, 192], sizes = [2, 64], strides = [1, 1]} : vector<2x256xf32> to vector<2x64xf32>
    %113 = arith.mulf %110, %86 : vector<2x64xf32>
    %114 = arith.mulf %109, %112 : vector<2x64xf32>
    %115 = arith.addf %113, %114 : vector<2x64xf32>
    %116 = math.tanh %115 : vector<2x64xf32>
    %117 = arith.mulf %111, %116 : vector<2x64xf32>
    %cst_34 = arith.constant dense<0.000000e+00> : vector<2x128xf32>
    %118 = tpu.matmul %117, %0, %cst_34 {dimension_numbers = #tpu.dot_dimension_numbers<[1], [0], [0], [1], [0, 0, 1, 1], [], []>} : vector<2x64xf32>, vector<64x128xf32>, vector<2x128xf32> -> vector<2x128xf32>
    %119 = arith.addf %118, %2 : vector<2x128xf32>
    %cst_35 = arith.constant dense<0xFF800000> : vector<2xf32>
    %120 = vector.multi_reduction <maximumf>, %119, %cst_35 [1] : vector<2x128xf32> to vector<2xf32>
    %121 = vector.shape_cast %120 : vector<2xf32> to vector<2x1xf32>
    %122 = vector.broadcast %121 : vector<2x1xf32> to vector<2x128xf32>
    %123 = arith.subf %119, %122 : vector<2x128xf32>
    %124 = math.exp %123 : vector<2x128xf32>
    %cst_36 = arith.constant dense<0.000000e+00> : vector<2xf32>
    %125 = vector.multi_reduction <add>, %124, %cst_36 [1] : vector<2x128xf32> to vector<2xf32>
    %126 = vector.shape_cast %125 : vector<2xf32> to vector<2x1xf32>
    %cst_37 = arith.constant dense<0.000000e+00> : vector<2x64xf32>
    %127 = tpu.matmul %124, %1, %cst_37 {dimension_numbers = #tpu.dot_dimension_numbers<[1], [0], [0], [1], [0, 0, 1, 1], [], []>} : vector<2x128xf32>, vector<128x64xf32>, vector<2x64xf32> -> vector<2x64xf32>
    %128 = vector.broadcast %126 : vector<2x1xf32> to vector<2x64xf32>
    %129 = arith.divf %127, %128 : vector<2x64xf32>
    %130 = tpu.concatenate %117, %129 in 1 : vector<2x64xf32>, vector<2x64xf32> -> vector<2x128xf32>
    %cst_38 = arith.constant dense<0.000000e+00> : vector<2x256xf32>
    %131 = tpu.matmul %130, %4, %cst_38 {dimension_numbers = #tpu.dot_dimension_numbers<[1], [0], [0], [1], [0, 0, 1, 1], [], []>} : vector<2x128xf32>, vector<128x256xf32>, vector<2x256xf32> -> vector<2x256xf32>
    %132 = arith.addf %131, %10 : vector<2x256xf32>
    %133 = math.tanh %132 : vector<2x256xf32>
    %cst_39 = arith.constant 5.000000e-01 : f32
    %134 = vector.broadcast %cst_39 : f32 to vector<2x256xf32>
    %135 = arith.mulf %134, %133 : vector<2x256xf32>
    %cst_40 = arith.constant 5.000000e-01 : f32
    %136 = vector.broadcast %cst_40 : f32 to vector<2x256xf32>
    %137 = arith.addf %135, %136 : vector<2x256xf32>
    %138 = vector.extract_strided_slice %137 {offsets = [0, 0], sizes = [2, 64], strides = [1, 1]} : vector<2x256xf32> to vector<2x64xf32>
    %139 = vector.extract_strided_slice %137 {offsets = [0, 64], sizes = [2, 64], strides = [1, 1]} : vector<2x256xf32> to vector<2x64xf32>
    %140 = vector.extract_strided_slice %137 {offsets = [0, 128], sizes = [2, 64], strides = [1, 1]} : vector<2x256xf32> to vector<2x64xf32>
    %141 = vector.extract_strided_slice %133 {offsets = [0, 192], sizes = [2, 64], strides = [1, 1]} : vector<2x256xf32> to vector<2x64xf32>
    %142 = arith.mulf %139, %115 : vector<2x64xf32>
    %143 = arith.mulf %138, %141 : vector<2x64xf32>
    %144 = arith.addf %142, %143 : vector<2x64xf32>
    %145 = math.tanh %144 : vector<2x64xf32>
    %146 = arith.mulf %140, %145 : vector<2x64xf32>
    %cst_41 = arith.constant dense<0.000000e+00> : vector<2x128xf32>
    %147 = tpu.matmul %146, %0, %cst_41 {dimension_numbers = #tpu.dot_dimension_numbers<[1], [0], [0], [1], [0, 0, 1, 1], [], []>} : vector<2x64xf32>, vector<64x128xf32>, vector<2x128xf32> -> vector<2x128xf32>
    %148 = arith.addf %147, %2 : vector<2x128xf32>
    %cst_42 = arith.constant dense<0xFF800000> : vector<2xf32>
    %149 = vector.multi_reduction <maximumf>, %148, %cst_42 [1] : vector<2x128xf32> to vector<2xf32>
    %150 = vector.shape_cast %149 : vector<2xf32> to vector<2x1xf32>
    %151 = vector.broadcast %150 : vector<2x1xf32> to vector<2x128xf32>
    %152 = arith.subf %148, %151 : vector<2x128xf32>
    %153 = math.exp %152 : vector<2x128xf32>
    %cst_43 = arith.constant dense<0.000000e+00> : vector<2xf32>
    %154 = vector.multi_reduction <add>, %153, %cst_43 [1] : vector<2x128xf32> to vector<2xf32>
    %155 = vector.shape_cast %154 : vector<2xf32> to vector<2x1xf32>
    %cst_44 = arith.constant dense<0.000000e+00> : vector<2x64xf32>
    %156 = tpu.matmul %153, %1, %cst_44 {dimension_numbers = #tpu.dot_dimension_numbers<[1], [0], [0], [1], [0, 0, 1, 1], [], []>} : vector<2x128xf32>, vector<128x64xf32>, vector<2x64xf32> -> vector<2x64xf32>
    %157 = vector.broadcast %155 : vector<2x1xf32> to vector<2x64xf32>
    %158 = arith.divf %156, %157 : vector<2x64xf32>
    %159 = tpu.concatenate %146, %158 in 1 : vector<2x64xf32>, vector<2x64xf32> -> vector<2x128xf32>
    %cst_45 = arith.constant dense<0.000000e+00> : vector<2x256xf32>
    %160 = tpu.matmul %159, %5, %cst_45 {dimension_numbers = #tpu.dot_dimension_numbers<[1], [0], [0], [1], [0, 0, 1, 1], [], []>} : vector<2x128xf32>, vector<128x256xf32>, vector<2x256xf32> -> vector<2x256xf32>
    %161 = vector.broadcast %11 : vector<1x256xf32> to vector<2x256xf32>
    %162 = arith.addf %160, %161 : vector<2x256xf32>
    %cst_46 = arith.constant 0.000000e+00 : f32
    %163 = vector.broadcast %cst_46 : f32 to vector<2x256xf32>
    %164 = arith.maximumf %162, %163 : vector<2x256xf32>
    %cst_47 = arith.constant dense<0.000000e+00> : vector<2x128xf32>
    %165 = tpu.matmul %164, %6, %cst_47 {dimension_numbers = #tpu.dot_dimension_numbers<[1], [0], [0], [1], [0, 0, 1, 1], [], []>} : vector<2x256xf32>, vector<256x128xf32>, vector<2x128xf32> -> vector<2x128xf32>
    %166 = vector.broadcast %12 : vector<1x128xf32> to vector<2x128xf32>
    %167 = arith.addf %165, %166 : vector<2x128xf32>
    %c0_48 = arith.constant 0 : index
    %c0_49 = arith.constant 0 : index
    %168 = vector.load %arg6[%c0_48, %c0_49] : memref<2x128xf32, #tpu.memory_space<vmem>>, vector<2x128xf32>
    tpu.vector_store %arg6[%c0_48, %c0_49], %167 {strides = array<i32>} : memref<2x128xf32, #tpu.memory_space<vmem>>, vector<2x128xf32>,
    return
  }
  func.func @transform_0(%arg0: i32) -> (i32, i32) {
    %c0_i32 = arith.constant 0 : i32
    %c0_i32_0 = arith.constant 0 : i32
    %c0_i32_1 = arith.constant 0 : i32
    return %c0_i32, %c0_i32_0 : i32, i32
  }
  func.func @transform_1(%arg0: i32) -> (i32, i32) {
    %c0_i32 = arith.constant 0 : i32
    %c0_i32_0 = arith.constant 0 : i32
    %c0_i32_1 = arith.constant 0 : i32
    return %c0_i32, %c0_i32_0 : i32, i32
  }
  func.func @transform_2(%arg0: i32) -> (i32, i32) {
    %c0_i32 = arith.constant 0 : i32
    %c0_i32_0 = arith.constant 0 : i32
    return %arg0, %c0_i32 : i32, i32
  }
  func.func @transform_3(%arg0: i32) -> (i32, i32) {
    %c0_i32 = arith.constant 0 : i32
    %c0_i32_0 = arith.constant 0 : i32
    %c0_i32_1 = arith.constant 0 : i32
    return %c0_i32, %c0_i32_0 : i32, i32
  }
  func.func @transform_4(%arg0: i32) -> (i32, i32) {
    %c0_i32 = arith.constant 0 : i32
    %c0_i32_0 = arith.constant 0 : i32
    %c0_i32_1 = arith.constant 0 : i32
    return %c0_i32, %c0_i32_0 : i32, i32
  }
  func.func @transform_5(%arg0: i32) -> (i32, i32) {
    %c0_i32 = arith.constant 0 : i32
    %c0_i32_0 = arith.constant 0 : i32
    return %arg0, %c0_i32 : i32, i32
  }
}

</mosaic_0001>

<bundles_post_ra>
// kernel: tpu_custom_call.1
= control target key start
LH: loop header
LB: loop body
LE: loop exit
PB: predicated region body
PF: predicated region fallthrough
CT: control target
= control target key end

     0   :  { %10 = vsyncpa [#allocation3], 0  ;;  %s2936_s0 = inlined_call_operand.vmem [shape: f32[64,128], index: 0, kind: input, shape index: {}]   ;;  %s2937_s1 = inlined_call_operand.vmem [shape: f32[128,64], index: 1, kind: input, shape index: {}]   ;;  %s2938_s2 = inlined_call_operand.vmem [shape: f32[2,128], index: 2, kind: input, shape index: {}]   ;;  %s2939_s3 = inlined_call_operand.hbm [shape: f32[512,256], index: 3, kind: input, shape index: {}]   ;;  %s2940_s4 = inlined_call_operand.vmem [shape: f32[3,256], index: 4, kind: input, shape index: {}]   ;;  %s2941_s5 = inlined_call_operand.hbm [shape: f32[2,128], index: 5, kind: output, shape index: {}]  }
   0x1   :  { %11 = vsyncpa [#allocation4], 0  ;;  %s2198_s18 = smov [#allocation2]  }
   0x2   :  { %s23_s19 = sshll.u32 %s2198_s18, 4  ;;  %s24_s19 = int_to_ptr.vmem [resolvable:$true] %s23_s19 }
   0x3   :  { %s2162_s20 = scalar_lea.vmem %s24_s19, 16384  ;;  %p2167_p1 = scmp.lt.s32.totalorder %s24_s19, %s24_s19 }
   0x4   :  { %p2163_p0 = scmp.ne.s32.totalorder %s24_s19, %s2162_s20  ;;  %p2168_p2 = scmp.lt.s32.totalorder %s2162_s20, %s2162_s20 }
   0x6   :  { %p2169_p3 = por %p2168_p2, %p2167_p1 }
   0x8   :  { %p2170_p4 = pnand %p2169_p3, %p2163_p0 }
   0xa   :  { %2173 = shalt.err (!%p2170_p4)
}
   0xb   :  { %s2199_s21 = smov 256   ;;  %s2200_s22 = smov 16  }
   0xc   :  { %29 = dma.hbm_to_vmem [thread:$0]  %s2939_s3, 16384, %s24_s19, [#allocation3], %s2199_s21, %s2199_s21, %s2200_s22  }
   0xd   :  { %2194 = dma.done.wait [#allocation3], 16384  }
   0xe   :  { %2195 = vsyncadd [#allocation3], 4294950912  ;;  %v2958_v0 = vmov 0.0   ;;  %v2240_v1 = vld [vmem:[#allocation2 + $0xf8] sm:$0xff]  ;;  %v2242_v2 = vld [vmem:[#allocation2 + $0xf0] sm:$0xff]  ;;  %v158_v33 = vlaneseq  ;;  %s2202_s26 = smov 64  }
   0xf   :  { %240 = vmatprep.mubr.f32.mxu0 %v2958_v0  ;;  %1794 = vmatprep.subr.mxu1 %v2958_v0  ;;  %v2244_v3 = vld [vmem:[#allocation2 + $0xe8] sm:$0xff]  ;;  %v2247_v4 = vld [vmem:[#allocation2 + $0xe0] sm:$0xff]  ;;  %v2250_v5 = vld [vmem:[#allocation2 + $0xd8] sm:$0xff]  ;;  %vm2203_vm0 = vmmov 0   ;;  %vm270_vm1 = vcmask 523264   ;;  %vm344_vm2 = vcmask 1041408  }
  0x10   :  { %176 = vmatprep.subr.mxu0 %v2240_v1  ;;  %v2253_v6 = vld [vmem:[#allocation2 + $0xd0] sm:$0xff]  ;;  %v2256_v7 = vld [vmem:[#allocation2 + $0xc8] sm:$0xff]  ;;  %v2259_v8 = vld [vmem:[#allocation2 + $0xc0] sm:$0xff]  ;;  %v2371_v34 = vshrl.u32 %v158_v33, 7  ;;  %1810 = vmatprep.mubr.msk.f32.mxu1 %vm2203_vm0, %v2958_v0  ;;  %s2204_s25 = smov [#allocation5]  }
  0x11   :  { %177 = vmatpush1.msra.mxu0 %v2242_v2  ;;  %v2262_v9 = vld [vmem:[#allocation2 + $0xb8] sm:$0xff]  ;;  %v2265_v10 = vld [vmem:[#allocation2 + $0xb0] sm:$0xff]  ;;  %v2268_v11 = vld [vmem:[#allocation2 + $0xa8] sm:$0xff]  ;;  %s1615_s27 = sshll.u32 %s2204_s25, 4  ;;  %s1616_s27 = int_to_ptr.vmem [resolvable:$true] %s1615_s27 }
  0x12   :  { %178 = vmatprep.subr.mxu0 %v2244_v3  ;;  %v2271_v12 = vld [vmem:[#allocation2 + $0xa0] sm:$0xff]  ;;  %v2274_v13 = vld [vmem:[#allocation2 + $0x98] sm:$0xff]  ;;  %v2277_v14 = vld [vmem:[#allocation2 + $0x90] sm:$0xff]  ;;  %2979 = vst [vmem:[#allocation11_spill] sm:$0xff] %v2371_v34  ;;  %v164_v35 = vsub.s32 4, %v2371_v34  ;;  %v160_v38 = vsub.s32 0, %v2371_v34  ;;  %p2179_p6 = scmp.lt.s32.totalorder %s1616_s27, %s1616_s27 }
  0x13   :  { %179 = vmatpush1.msra.mxu0 %v2247_v4  ;;  %v2280_v15 = vld [vmem:[#allocation2 + $0x88] sm:$0xff]  ;;  %v2283_v16 = vld [vmem:[#allocation2 + $0x80] sm:$0xff]  ;;  %v2286_v17 = vld [vmem:[#allocation2 + $0x78] sm:$0xff] }
  0x14   :  { %180 = vmatprep.subr.mxu0 %v2250_v5  ;;  %v2289_v18 = vld [vmem:[#allocation2 + $0x70] sm:$0xff]  ;;  %v2292_v19 = vld [vmem:[#allocation2 + $0x68] sm:$0xff]  ;;  %v2295_v20 = vld [vmem:[#allocation2 + $0x60] sm:$0xff] }
  0x15   :  { %181 = vmatpush1.msra.mxu0 %v2253_v6  ;;  %v2298_v21 = vld [vmem:[#allocation2 + $0x58] sm:$0xff]  ;;  %v2301_v22 = vld [vmem:[#allocation2 + $0x50] sm:$0xff]  ;;  %v2304_v23 = vld [vmem:[#allocation2 + $0x48] sm:$0xff] }
  0x16   :  { %182 = vmatprep.subr.mxu0 %v2256_v7  ;;  %v2307_v24 = vld [vmem:[#allocation2 + $0x40] sm:$0xff]  ;;  %v2310_v25 = vld [vmem:[#allocation2 + $0x38] sm:$0xff]  ;;  %v2313_v26 = vld [vmem:[#allocation2 + $0x30] sm:$0xff] }
  0x17   :  { %183 = vmatpush1.msra.mxu0 %v2259_v8  ;;  %v2316_v27 = vld [vmem:[#allocation2 + $0x28] sm:$0xff]  ;;  %v2319_v28 = vld [vmem:[#allocation2 + $0x20] sm:$0xff]  ;;  %v2322_v29 = vld [vmem:[#allocation2 + $0x18] sm:$0xff] }
  0x18   :  { %184 = vmatprep.subr.mxu0 %v2262_v9  ;;  %v2325_v30 = vld [vmem:[#allocation2 + $0x10] sm:$0xff]  ;;  %v2328_v31 = vld [vmem:[#allocation2 + $0x8] sm:$0xff]  ;;  %v2331_v32 = vld [vmem:[#allocation2] sm:$0xff] }
  0x19   :  { %185 = vmatpush1.msra.mxu0 %v2265_v10  ;;  %2976 = vst [vmem:[#allocation8_spill] sm:$0xff] %v2325_v30  ;;  %2977 = vst [vmem:[#allocation9_spill] sm:$0xff] %v2328_v31  ;;  %v156_v36 = vld [vmem:[%s2940_s4] sm:$0x77]  ;;  %v2389_v52 = vld [vmem:[%s2936_s0 + $0x38] sm:$0xff] }
  0x1a   :  { %186 = vmatprep.subr.mxu0 %v2268_v11  ;;  %2978 = vst [vmem:[#allocation10_spill] sm:$0xff] %v2331_v32  ;;  %v165_v37 = vrot.slane %v156_v36, %v164_v35  ;;  %v161_v44 = vrot.slane %v156_v36, %v160_v38  ;;  %v2394_v53 = vld [vmem:[%s2936_s0 + $0x30] sm:$0xff]  ;;  %1795 = vmatpush3.msra.mxu1 %v2389_v52  ;;  %v2401_v54 = vld [vmem:[%s2936_s0 + $0x28] sm:$0xff]  ;;  %v2408_v55 = vld [vmem:[%s2936_s0 + $0x20] sm:$0xff] }
  0x1b   :  { %187 = vmatpush1.msra.mxu0 %v2271_v12  ;;  %1796 = vmatprep.subr.mxu1 %v2958_v0  ;;  %v2415_v56 = vld [vmem:[%s2936_s0 + $0x18] sm:$0xff]  ;;  %v2422_v57 = vld [vmem:[%s2936_s0 + $0x10] sm:$0xff]  ;;  %v2433_v61 = vld [vmem:[%s2936_s0 + $0x8] sm:$0xff] }
  0x1c   :  { %188 = vmatprep.subr.mxu0 %v2274_v13  ;;  %v2378_v39 = vrot.slane %v165_v37, %v160_v38  ;;  %v2382_v45 = vrot.slane %v161_v44, %v160_v38  ;;  %1797 = vmatpush3.msra.mxu1 %v2394_v53  ;;  %2981 = vst [vmem:[#allocation13_spill] sm:$0xff] %v2422_v57  ;;  %v2441_v62 = vld [vmem:[%s2936_s0] sm:$0xff]  ;;  %v2457_v38 = vld [vmem:[%s2937_s1 + $0x78] sm:$0xff]  ;;  %v2490_v44 = vld [vmem:[%s2937_s1 + $0x50] sm:$0xff] }
  0x1d   :  { %189 = vmatpush1.msra.mxu0 %v2277_v14  ;;  %1798 = vmatprep.subr.mxu1 %v2958_v0 }
  0x1e   :  { %190 = vmatprep.subr.mxu0 %v2280_v15  ;;  %2980 = vst [vmem:[#allocation12_spill] sm:$0xff] %v2382_v45  ;;  %1799 = vmatpush3.msra.mxu1 %v2401_v54 }
  0x1f   :  { %191 = vmatpush1.msra.mxu0 %v2283_v16  ;;  %1800 = vmatprep.subr.mxu1 %v2958_v0 }
  0x20   :  { %192 = vmatprep.subr.mxu0 %v2286_v17  ;;  %1801 = vmatpush3.msra.mxu1 %v2408_v55 }
  0x21   :  { %193 = vmatpush1.msra.mxu0 %v2289_v18  ;;  %1802 = vmatprep.subr.mxu1 %v2958_v0 }
  0x22   :  { %194 = vmatprep.subr.mxu0 %v2292_v19  ;;  %1803 = vmatpush3.msra.mxu1 %v2415_v56 }
  0x23   :  { %195 = vmatpush1.msra.mxu0 %v2295_v20  ;;  %1804 = vmatprep.subr.mxu1 %v2958_v0 }
  0x24   :  { %196 = vmatprep.subr.mxu0 %v2298_v21  ;;  %1805 = vmatpush3.msra.mxu1 %v2422_v57 }
  0x25   :  { %197 = vmatpush1.msra.mxu0 %v2301_v22  ;;  %1806 = vmatprep.subr.mxu1 %v2958_v0 }
  0x26   :  { %198 = vmatprep.subr.mxu0 %v2304_v23  ;;  %1807 = vmatpush3.msra.mxu1 %v2433_v61 }
  0x27   :  { %199 = vmatpush1.msra.mxu0 %v2307_v24  ;;  %1808 = vmatprep.subr.mxu1 %v2958_v0 }
  0x28   :  { %200 = vmatprep.subr.mxu0 %v2310_v25  ;;  %1809 = vmatpush3.msra.mxu1 %v2441_v62 }
  0x29   :  { %201 = vmatpush1.msra.mxu0 %v2313_v26  ;;  %1813 = vmatprep.subr.mxu1 %v2958_v0 }
  0x2a   :  { %202 = vmatprep.subr.mxu0 %v2316_v27 }
  0x2b   :  { %203 = vmatpush1.msra.mxu0 %v2319_v28 }
  0x2c   :  { %204 = vmatprep.subr.mxu0 %v2322_v29 }
  0x2d   :  { %205 = vmatpush1.msra.mxu0 %v2325_v30 }
  0x2e   :  { %206 = vmatprep.subr.mxu0 %v2328_v31 }
  0x2f   :  { %207 = vmatpush1.msra.mxu0 %v2331_v32 }
  0x30   :  { %241 = vmatmul.mubr.f32.vlgmr.msra.gmra.mxu0 %v2958_v0  ;;  %431 = vmatprep.subr.mxu0 %v2240_v1 }
  0x31   :  { %432 = vmatpush1.msra.mxu0 %v2242_v2  ;;  %495 = vmatprep.mubr.f32.mxu0 %v2958_v0 }
  0x32   :  { %433 = vmatprep.subr.mxu0 %v2244_v3 }
  0x33   :  { %434 = vmatpush1.msra.mxu0 %v2247_v4 }
  0x34   :  { %435 = vmatprep.subr.mxu0 %v2250_v5 }
  0x35   :  { %436 = vmatpush1.msra.mxu0 %v2253_v6 }
  0x36   :  { %437 = vmatprep.subr.mxu0 %v2256_v7 }
  0x37   :  { %438 = vmatpush1.msra.mxu0 %v2259_v8 }
  0x38   :  { %439 = vmatprep.subr.mxu0 %v2262_v9 }
  0x39   :  { %440 = vmatpush1.msra.mxu0 %v2265_v10 }
  0x3a   :  { %441 = vmatprep.subr.mxu0 %v2268_v11 }
  0x3b   :  { %442 = vmatpush1.msra.mxu0 %v2271_v12 }
  0x3c   :  { %443 = vmatprep.subr.mxu0 %v2274_v13 }
  0x3d   :  { %444 = vmatpush1.msra.mxu0 %v2277_v14 }
  0x3e   :  { %445 = vmatprep.subr.mxu0 %v2280_v15 }
  0x3f   :  { %446 = vmatpush1.msra.mxu0 %v2283_v16 }
  0x40   :  { %447 = vmatprep.subr.mxu0 %v2286_v17 }
  0x41   :  { %448 = vmatpush1.msra.mxu0 %v2289_v18 }
  0x42   :  { %449 = vmatprep.subr.mxu0 %v2292_v19 }
  0x43   :  { %450 = vmatpush1.msra.mxu0 %v2295_v20 }
  0x44   :  { %451 = vmatprep.subr.mxu0 %v2298_v21 }
  0x45   :  { %452 = vmatpush1.msra.mxu0 %v2301_v22 }
  0x46   :  { %453 = vmatprep.subr.mxu0 %v2304_v23 }
  0x47   :  { %454 = vmatpush1.msra.mxu0 %v2307_v24 }
  0x48   :  { %455 = vmatprep.subr.mxu0 %v2310_v25 }
  0x49   :  { %456 = vmatpush1.msra.mxu0 %v2313_v26 }
  0x4a   :  { %457 = vmatprep.subr.mxu0 %v2316_v27 }
  0x4b   :  { %458 = vmatpush1.msra.mxu0 %v2319_v28 }
  0x4c   :  { %459 = vmatprep.subr.mxu0 %v2322_v29 }
  0x4d   :  { %460 = vmatpush1.msra.mxu0 %v2325_v30 }
  0x4e   :  { %461 = vmatprep.subr.mxu0 %v2328_v31 }
  0x4f   :  { %462 = vmatpush1.msra.mxu0 %v2331_v32 }
  0x50   :  { %1867 = vmatprep.subr.mxu0 %v2958_v0 }
  0xf0   :  { %v242_v40 = vpop.f32.mrf.mxu0 }
  0xf1   :  { %v243_v46 = vadd.f32 %v242_v40, %v2382_v45  ;;  %v2462_v40 = vld [vmem:[%s2937_s1 + $0x70] sm:$0xff] }
  0xf2   :  { %v244_v41 = vpop.f32.mrf.mxu0 }
  0xf3   :  { %v245_v42 = vadd.f32 %v244_v41, %v2378_v39  ;;  %v2469_v41 = vld [vmem:[%s2937_s1 + $0x68] sm:$0xff] }
  0xf5   :  { %2071 = vtanh.f32 %v245_v42  ;;  %v2476_v42 = vld [vmem:[%s2937_s1 + $0x60] sm:$0xff] }
  0xf6   :  { %2073 = vtanh.f32 %v243_v46  ;;  %v2497_v46 = vld [vmem:[%s2937_s1 + $0x48] sm:$0xff] }
 0x102   :  { %v2072_v43 = vpop.eup %2071 }
 0x103   :  { %255 = vrot.lane.b32.xlu0 %v2072_v43, %s2202_s26  ;;  %v2074_v47 = vpop.eup %2073  ;;  %v250_v33 = vmul.f32 0.5, %v2072_v43  ;;  %v2483_v43 = vld [vmem:[%s2937_s1 + $0x58] sm:$0xff] }
 0x104   :  { %v249_v48 = vmul.f32 0.5, %v2074_v47  ;;  %v2506_v47 = vld [vmem:[%s2938_s2] sm:$0x3] }
 0x105   :  { %v252_v35 = vadd.f32 0.5, %v250_v33  ;;  %2982 = vst [vmem:[#allocation14_spill] sm:$0xff] %v2506_v47  ;;  %v2532_v33 = vld [vmem:[%s2937_s1 + $0x28] sm:$0xff] }
 0x106   :  { %v251_v49 = vadd.f32 0.5, %v249_v48  ;;  %2986 = vst [vmem:[#allocation18_spill] sm:$0xff] %v2532_v33 }
 0x108   :  { %v253_v58 = vmul.f32 0.0, %v251_v49 }
 0x175   :  { %v256_v50 = vpop.permute.xlu0 %255 }
 0x176   :  { %v258_v51 = vmul.f32 %v256_v50, %v251_v49 }
 0x178   :  { %260 = vrot.lane.b32.xlu0 %v258_v51, %s2202_s26 }
 0x1ea   :  { %v261_v59 = vpop.permute.xlu0 %260 }
 0x1eb   :  { %v2428_v60 = vadd.f32 %v261_v59, %v253_v58  ;;  %v2513_v58 = vld [vmem:[%s2937_s1 + $0x40] sm:$0xff]  ;;  %v2520_v59 = vld [vmem:[%s2937_s1 + $0x38] sm:$0xff] }
 0x1ec   :  { %2983 = vst [vmem:[#allocation15_spill] sm:$0xff] %v2513_v58  ;;  %2984 = vst [vmem:[#allocation16_spill] sm:$0xff] %v2520_v59 }
 0x1ed   :  { %2075 = vtanh.f32 %v2428_v60 }
 0x1fa   :  { %v2076_v63 = vpop.eup %2075 }
 0x1fb   :  { %266 = vrot.lane.b32.xlu1 %v2076_v63, %s2202_s26  ;;  %v2527_v63 = vld [vmem:[%s2937_s1 + $0x30] sm:$0xff] }
 0x1fc   :  { %2985 = vst [vmem:[#allocation17_spill] sm:$0xff] %v2527_v63 }
 0x26d   :  { %v267_v36 = vpop.permute.xlu1 %266 }
 0x26e   :  { %v2448_v37 = vmul.f32 %v267_v36, %v252_v35  ;;  %v2539_v35 = vld [vmem:[%s2937_s1 + $0x20] sm:$0xff]  ;;  %v2546_v36 = vld [vmem:[%s2937_s1 + $0x18] sm:$0xff] }
 0x26f   :  { %2987 = vst [vmem:[#allocation19_spill] sm:$0xff] %v2539_v35  ;;  %2988 = vst [vmem:[#allocation20_spill] sm:$0xff] %v2546_v36 }
 0x270   :  { %1811 = vmatmul.mubr.msk.f32.vlgmr.msra.gmra.mxu1 %vm270_vm1, %v2448_v37 }
 0x271   :  { %1845 = vmatprep.mubr.msk.f32.mxu1 %vm2203_vm0, %v2958_v0  ;;  %1814 = vmatpush3.msra.mxu1 %v2457_v38 }
 0x272   :  { %1815 = vmatprep.subr.mxu1 %v2958_v0 }
 0x273   :  { %1816 = vmatpush3.msra.mxu1 %v2462_v40 }
 0x274   :  { %1817 = vmatprep.subr.mxu1 %v2958_v0 }
 0x275   :  { %1818 = vmatpush3.msra.mxu1 %v2469_v41 }
 0x276   :  { %1819 = vmatprep.subr.mxu1 %v2958_v0 }
 0x277   :  { %1820 = vmatpush3.msra.mxu1 %v2476_v42 }
 0x278   :  { %1821 = vmatprep.subr.mxu1 %v2958_v0 }
 0x279   :  { %1822 = vmatpush3.msra.mxu1 %v2483_v43 }
 0x27a   :  { %1823 = vmatprep.subr.mxu1 %v2958_v0 }
 0x27b   :  { %1824 = vmatpush3.msra.mxu1 %v2490_v44 }
 0x27c   :  { %1825 = vmatprep.subr.mxu1 %v2958_v0 }
 0x27d   :  { %1826 = vmatpush3.msra.mxu1 %v2497_v46 }
 0x27e   :  { %1827 = vmatprep.subr.mxu1 %v2958_v0 }
 0x27f   :  { %1828 = vmatpush3.msra.mxu1 %v2513_v58 }
 0x280   :  { %1829 = vmatprep.subr.mxu1 %v2958_v0 }
 0x281   :  { %1830 = vmatpush3.msra.mxu1 %v2520_v59 }
 0x282   :  { %1831 = vmatprep.subr.mxu1 %v2958_v0 }
 0x283   :  { %1832 = vmatpush3.msra.mxu1 %v2527_v63 }
 0x284   :  { %1833 = vmatprep.subr.mxu1 %v2958_v0 }
 0x285   :  { %1834 = vmatpush3.msra.mxu1 %v2532_v33 }
 0x286   :  { %1835 = vmatprep.subr.mxu1 %v2958_v0 }
 0x287   :  { %1836 = vmatpush3.msra.mxu1 %v2539_v35 }
 0x288   :  { %1837 = vmatprep.subr.mxu1 %v2958_v0 }
 0x289   :  { %1838 = vmatpush3.msra.mxu1 %v2546_v36 }
 0x28a   :  { %1839 = vmatprep.subr.mxu1 %v2958_v0 }
 0x330   :  { %v340_v48 = vpop.f32.mrf.mxu1 }
 0x331   :  { %v341_v49 = vadd.f32 %v340_v48, %v2506_v47  ;;  %v2553_v48 = vld [vmem:[%s2937_s1 + $0x10] sm:$0xff] }
 0x332   :  { %v1812_v50 = vpop.f32.mrf.mxu1  ;;  %2989 = vst [vmem:[#allocation21_spill] sm:$0xff] %v2553_v48  ;;  %1840 = vmatpush3.msra.mxu1 %v2553_v48 }
 0x333   :  { %v345_v51 = vsel %vm344_vm2, %v341_v49, -inf  ;;  %v2560_v50 = vld [vmem:[%s2937_s1 + $0x8] sm:$0xff]  ;;  %1841 = vmatprep.subr.mxu1 %v2958_v0 }
 0x334   :  { %346 = vmax.xlane.f32.xlu1 %v345_v51  ;;  %2990 = vst [vmem:[#allocation22_spill] sm:$0xff] %v2560_v50  ;;  %v2567_v51 = vld [vmem:[%s2937_s1] sm:$0xff]  ;;  %1842 = vmatpush3.msra.mxu1 %v2560_v50 }
 0x335   :  { %2991 = vst [vmem:[#allocation23_spill] sm:$0xff] %v2567_v51  ;;  %1843 = vmatprep.subr.mxu1 %v2958_v0 }
 0x336   :  { %1844 = vmatpush3.msra.mxu1 %v2567_v51 }
 0x337   :  { %1848 = vmatprep.subr.mxu1 %v2958_v0 }
 0x3bd   :  { %v347_v34 = vpop.xlane.xlu1 %346 }
 0x3be   :  { %v348_v47 = vsub.f32 %v341_v49, %v347_v34 }
 0x3c0   :  { %v349_v32 = vmul.f32 1.442695, %v348_v47 }
 0x3c2   :  { %2077 = vpow2.f32 %v349_v32 }
 0x3cf   :  { %v2078_v31 = vpop.eup %2077 }
 0x3d0   :  { %1846 = vmatmul.mubr.f32.vlgmr.msra.gmra.mxu1 %v2078_v31  ;;  %v351_v30 = vsel %vm344_vm2, %v2078_v31, 0.0 }
 0x3d1   :  { %352 = vadd.xlane.f32.xlu0 %v351_v30  ;;  %1849 = vmatpush3.msra.mxu1 %v2389_v52 }
 0x3d2   :  { %1850 = vmatprep.subr.mxu1 %v2958_v0  ;;  %1864 = vmatprep.mubr.msk.f32.mxu1 %vm2203_vm0, %v2958_v0 }
 0x3d3   :  { %1851 = vmatpush3.msra.mxu1 %v2394_v53 }
 0x3d4   :  { %1852 = vmatprep.subr.mxu1 %v2958_v0 }
 0x3d5   :  { %1853 = vmatpush3.msra.mxu1 %v2401_v54 }
 0x3d6   :  { %1854 = vmatprep.subr.mxu1 %v2958_v0 }
 0x3d7   :  { %1855 = vmatpush3.msra.mxu1 %v2408_v55 }
 0x3d8   :  { %1856 = vmatprep.subr.mxu1 %v2958_v0 }
 0x3d9   :  { %1857 = vmatpush3.msra.mxu1 %v2415_v56 }
 0x3da   :  { %1858 = vmatprep.subr.mxu1 %v2958_v0 }
 0x3db   :  { %1859 = vmatpush3.msra.mxu1 %v2422_v57 }
 0x3dc   :  { %1860 = vmatprep.subr.mxu1 %v2958_v0 }
 0x3dd   :  { %1861 = vmatpush3.msra.mxu1 %v2433_v61 }
 0x3de   :  { %1862 = vmatprep.subr.mxu1 %v2958_v0 }
 0x3df   :  { %1863 = vmatpush3.msra.mxu1 %v2441_v62 }
 0x3e0   :  { %684 = vmatprep.subr.mxu1 %v2240_v1 }
 0x45a   :  { %v353_v30 = vpop.xlane.xlu0 %352 }
 0x45b   :  { %2079 = vrcp.f32 %v353_v30 }
 0x468   :  { %v2080_v31 = vpop.eup %2079 }
 0x490   :  { %v420_v32 = vpop.f32.mrf.mxu1 }
 0x491   :  { %v425_v34 = vmul.f32 %v2080_v31, %v420_v32 }
 0x492   :  { %v1847_v47 = vpop.f32.mrf.mxu1 }
 0x493   :  { %427 = vrot.lane.b32.xlu0 %v425_v34, %s2202_s26 }
 0x505   :  { %v428_v49 = vpop.permute.xlu0 %427 }
 0x506   :  { %v430_v57 = vsel %vm270_vm1, %v2448_v37, %v428_v49 }
 0x507   :  { %496 = vmatmul.mubr.f32.vlgmr.msra.gmra.mxu0 %v430_v57 }
 0x508   :  { %1868 = vmatpush3.msra.mxu0 %v2457_v38  ;;  %1899 = vmatprep.mubr.msk.f32.mxu0 %vm2203_vm0, %v2958_v0 }
 0x509   :  { %1869 = vmatprep.subr.mxu0 %v2958_v0 }
 0x50a   :  { %1870 = vmatpush3.msra.mxu0 %v2462_v40 }
 0x50b   :  { %1871 = vmatprep.subr.mxu0 %v2958_v0 }
 0x50c   :  { %1872 = vmatpush3.msra.mxu0 %v2469_v41 }
 0x50d   :  { %1873 = vmatprep.subr.mxu0 %v2958_v0 }
 0x50e   :  { %1874 = vmatpush3.msra.mxu0 %v2476_v42 }
 0x50f   :  { %1875 = vmatprep.subr.mxu0 %v2958_v0 }
 0x510   :  { %1876 = vmatpush3.msra.mxu0 %v2483_v43 }
 0x511   :  { %1877 = vmatprep.subr.mxu0 %v2958_v0 }
 0x512   :  { %1878 = vmatpush3.msra.mxu0 %v2490_v44 }
 0x513   :  { %1879 = vmatprep.subr.mxu0 %v2958_v0 }
 0x514   :  { %1880 = vmatpush3.msra.mxu0 %v2497_v46 }
 0x515   :  { %1881 = vmatprep.subr.mxu0 %v2958_v0 }
 0x516   :  { %1882 = vmatpush3.msra.mxu0 %v2513_v58 }
 0x517   :  { %1883 = vmatprep.subr.mxu0 %v2958_v0 }
 0x518   :  { %1884 = vmatpush3.msra.mxu0 %v2520_v59 }
 0x519   :  { %1885 = vmatprep.subr.mxu0 %v2958_v0 }
 0x51a   :  { %1886 = vmatpush3.msra.mxu0 %v2527_v63 }
 0x51b   :  { %1887 = vmatprep.subr.mxu0 %v2958_v0 }
 0x51c   :  { %1888 = vmatpush3.msra.mxu0 %v2532_v33 }
 0x51d   :  { %1889 = vmatprep.subr.mxu0 %v2958_v0 }
 0x51e   :  { %1890 = vmatpush3.msra.mxu0 %v2539_v35 }
 0x51f   :  { %1891 = vmatprep.subr.mxu0 %v2958_v0 }
 0x520   :  { %1892 = vmatpush3.msra.mxu0 %v2546_v36 }
 0x521   :  { %1893 = vmatprep.subr.mxu0 %v2958_v0 }
 0x522   :  { %1894 = vmatpush3.msra.mxu0 %v2553_v48 }
 0x523   :  { %1895 = vmatprep.subr.mxu0 %v2958_v0 }
 0x524   :  { %1896 = vmatpush3.msra.mxu0 %v2560_v50 }
 0x525   :  { %1897 = vmatprep.subr.mxu0 %v2958_v0 }
 0x526   :  { %1898 = vmatpush3.msra.mxu0 %v2567_v51 }
 0x527   :  { %1902 = vmatprep.subr.mxu0 %v2958_v0 }
 0x5c7   :  { %v497_v57 = vpop.f32.mrf.mxu0 }
 0x5c8   :  { %v498_v32 = vadd.f32 %v497_v57, %v2382_v45 }
 0x5c9   :  { %v499_v37 = vpop.f32.mrf.mxu0 }
 0x5ca   :  { %v500_v30 = vadd.f32 %v499_v37, %v2378_v39 }
 0x5cc   :  { %2081 = vtanh.f32 %v500_v30 }
 0x5cd   :  { %2083 = vtanh.f32 %v498_v32 }
 0x5d9   :  { %v2082_v31 = vpop.eup %2081 }
 0x5da   :  { %510 = vrot.lane.b32.xlu1 %v2082_v31, %s2202_s26  ;;  %v2084_v34 = vpop.eup %2083  ;;  %v505_v30 = vmul.f32 0.5, %v2082_v31  ;;  %v2996_v31 = vld [vmem:[#allocation14_spill] sm:$0xff] }
 0x5db   :  { %v504_v47 = vmul.f32 0.5, %v2084_v34 }
 0x5dc   :  { %v507_v57 = vadd.f32 0.5, %v505_v30 }
 0x5dd   :  { %v506_v49 = vadd.f32 0.5, %v504_v47 }
 0x5df   :  { %v508_v0 = vmul.f32 %v506_v49, %v2428_v60  ;;  %v2994_v60 = vld [vmem:[#allocation9_spill] sm:$0xff] }
 0x64c   :  { %v511_v50 = vpop.permute.xlu1 %510 }
 0x64d   :  { %v513_v48 = vmul.f32 %v511_v50, %v506_v49  ;;  %v2995_v50 = vld [vmem:[#allocation10_spill] sm:$0xff] }
 0x64f   :  { %515 = vrot.lane.b32.xlu1 %v513_v48, %s2202_s26  ;;  %v2992_v48 = vmov 0.0  }
 0x6c1   :  { %v516_v51 = vpop.permute.xlu1 %515 }
 0x6c2   :  { %v2634_v36 = vadd.f32 %v516_v51, %v508_v0  ;;  %v2993_v0 = vld [vmem:[#allocation8_spill] sm:$0xff] }
 0x6c4   :  { %2085 = vtanh.f32 %v2634_v36 }
 0x6d1   :  { %v2086_v37 = vpop.eup %2085 }
 0x6d2   :  { %521 = vrot.lane.b32.xlu0 %v2086_v37, %s2202_s26 }
 0x744   :  { %v522_v32 = vpop.permute.xlu0 %521 }
 0x745   :  { %v2638_v45 = vmul.f32 %v522_v32, %v507_v57 }
 0x747   :  { %1865 = vmatmul.mubr.msk.f32.vlgmr.msra.gmra.mxu1 %vm270_vm1, %v2638_v45 }
 0x748   :  { %685 = vmatpush1.msra.mxu1 %v2242_v2  ;;  %748 = vmatprep.mubr.f32.mxu1 %v2992_v48 }
 0x749   :  { %686 = vmatprep.subr.mxu1 %v2244_v3 }
 0x74a   :  { %687 = vmatpush1.msra.mxu1 %v2247_v4 }
 0x74b   :  { %688 = vmatprep.subr.mxu1 %v2250_v5 }
 0x74c   :  { %689 = vmatpush1.msra.mxu1 %v2253_v6 }
 0x74d   :  { %690 = vmatprep.subr.mxu1 %v2256_v7 }
 0x74e   :  { %691 = vmatpush1.msra.mxu1 %v2259_v8 }
 0x74f   :  { %692 = vmatprep.subr.mxu1 %v2262_v9 }
 0x750   :  { %693 = vmatpush1.msra.mxu1 %v2265_v10 }
 0x751   :  { %694 = vmatprep.subr.mxu1 %v2268_v11 }
 0x752   :  { %695 = vmatpush1.msra.mxu1 %v2271_v12 }
 0x753   :  { %696 = vmatprep.subr.mxu1 %v2274_v13 }
 0x754   :  { %697 = vmatpush1.msra.mxu1 %v2277_v14 }
 0x755   :  { %698 = vmatprep.subr.mxu1 %v2280_v15 }
 0x756   :  { %699 = vmatpush1.msra.mxu1 %v2283_v16 }
 0x757   :  { %700 = vmatprep.subr.mxu1 %v2286_v17 }
 0x758   :  { %701 = vmatpush1.msra.mxu1 %v2289_v18 }
 0x759   :  { %702 = vmatprep.subr.mxu1 %v2292_v19 }
 0x75a   :  { %703 = vmatpush1.msra.mxu1 %v2295_v20 }
 0x75b   :  { %704 = vmatprep.subr.mxu1 %v2298_v21 }
 0x75c   :  { %705 = vmatpush1.msra.mxu1 %v2301_v22 }
 0x75d   :  { %706 = vmatprep.subr.mxu1 %v2304_v23 }
 0x75e   :  { %707 = vmatpush1.msra.mxu1 %v2307_v24 }
 0x75f   :  { %708 = vmatprep.subr.mxu1 %v2310_v25 }
 0x760   :  { %709 = vmatpush1.msra.mxu1 %v2313_v26 }
 0x761   :  { %710 = vmatprep.subr.mxu1 %v2316_v27 }
 0x762   :  { %711 = vmatpush1.msra.mxu1 %v2319_v28 }
 0x763   :  { %712 = vmatprep.subr.mxu1 %v2322_v29 }
 0x764   :  { %713 = vmatpush1.msra.mxu1 %v2993_v0 }
 0x765   :  { %714 = vmatprep.subr.mxu1 %v2994_v60 }
 0x766   :  { %715 = vmatpush1.msra.mxu1 %v2995_v50 }
 0x767   :  { %1921 = vmatprep.subr.mxu1 %v2992_v48 }
 0x807   :  { %v594_v51 = vpop.f32.mrf.mxu1 }
 0x808   :  { %v595_v34 = vadd.f32 %v594_v51, %v2996_v31 }
 0x809   :  { %v1866_v47 = vpop.f32.mrf.mxu1 }
 0x80a   :  { %v598_v49 = vsel %vm344_vm2, %v595_v34, -inf }
 0x80b   :  { %599 = vmax.xlane.f32.xlu1 %v598_v49 }
 0x894   :  { %v600_v37 = vpop.xlane.xlu1 %599 }
 0x895   :  { %v601_v30 = vsub.f32 %v595_v34, %v600_v37 }
 0x897   :  { %v602_v57 = vmul.f32 1.442695, %v601_v30 }
 0x899   :  { %2087 = vpow2.f32 %v602_v57 }
 0x8a6   :  { %v2088_v32 = vpop.eup %2087 }
 0x8a7   :  { %1900 = vmatmul.mubr.f32.vlgmr.msra.gmra.mxu0 %v2088_v32  ;;  %v604_v0 = vsel %vm344_vm2, %v2088_v32, 0.0  ;;  %v2999_v32 = vld [vmem:[#allocation21_spill] sm:$0xff] }
 0x8a8   :  { %605 = vadd.xlane.f32.xlu0 %v604_v0  ;;  %1903 = vmatpush3.msra.mxu0 %v2389_v52  ;;  %v2997_v0 = vld [vmem:[#allocation13_spill] sm:$0xff] }
 0x8a9   :  { %1904 = vmatprep.subr.mxu0 %v2992_v48  ;;  %1918 = vmatprep.mubr.msk.f32.mxu0 %vm2203_vm0, %v2992_v48 }
 0x8aa   :  { %1905 = vmatpush3.msra.mxu0 %v2394_v53 }
 0x8ab   :  { %1906 = vmatprep.subr.mxu0 %v2992_v48 }
 0x8ac   :  { %1907 = vmatpush3.msra.mxu0 %v2401_v54 }
 0x8ad   :  { %1908 = vmatprep.subr.mxu0 %v2992_v48 }
 0x8ae   :  { %1909 = vmatpush3.msra.mxu0 %v2408_v55 }
 0x8af   :  { %1910 = vmatprep.subr.mxu0 %v2992_v48 }
 0x8b0   :  { %1911 = vmatpush3.msra.mxu0 %v2415_v56 }
 0x8b1   :  { %1912 = vmatprep.subr.mxu0 %v2992_v48 }
 0x8b2   :  { %1913 = vmatpush3.msra.mxu0 %v2997_v0 }
 0x8b3   :  { %1914 = vmatprep.subr.mxu0 %v2992_v48 }
 0x8b4   :  { %1915 = vmatpush3.msra.mxu0 %v2433_v61 }
 0x8b5   :  { %1916 = vmatprep.subr.mxu0 %v2992_v48 }
 0x8b6   :  { %1917 = vmatpush3.msra.mxu0 %v2441_v62 }
 0x8b7   :  { %937 = vmatprep.subr.mxu0 %v2240_v1 }
 0x931   :  { %v606_v51 = vpop.xlane.xlu0 %605 }
 0x932   :  { %2089 = vrcp.f32 %v606_v51  ;;  %v3000_v51 = vld [vmem:[#allocation22_spill] sm:$0xff] }
 0x93f   :  { %v2090_v34 = vpop.eup %2089 }
 0x967   :  { %v673_v47 = vpop.f32.mrf.mxu0 }
 0x968   :  { %v678_v49 = vmul.f32 %v2090_v34, %v673_v47  ;;  %v3001_v34 = vld [vmem:[#allocation23_spill] sm:$0xff] }
 0x969   :  { %v1901_v37 = vpop.f32.mrf.mxu0 }
 0x96a   :  { %680 = vrot.lane.b32.xlu0 %v678_v49, %s2202_s26 }
 0x9dc   :  { %v681_v30 = vpop.permute.xlu0 %680 }
 0x9dd   :  { %v683_v57 = vsel %vm270_vm1, %v2638_v45, %v681_v30  ;;  %v2998_v45 = vld [vmem:[#allocation20_spill] sm:$0xff] }
 0x9de   :  { %749 = vmatmul.mubr.f32.vlgmr.msra.gmra.mxu1 %v683_v57  ;;  %v3002_v57 = vld [vmem:[#allocation12_spill] sm:$0xff] }
 0x9df   :  { %1922 = vmatpush3.msra.mxu1 %v2457_v38  ;;  %1953 = vmatprep.mubr.msk.f32.mxu1 %vm2203_vm0, %v2992_v48 }
 0x9e0   :  { %1923 = vmatprep.subr.mxu1 %v2992_v48 }
 0x9e1   :  { %1924 = vmatpush3.msra.mxu1 %v2462_v40 }
 0x9e2   :  { %1925 = vmatprep.subr.mxu1 %v2992_v48 }
 0x9e3   :  { %1926 = vmatpush3.msra.mxu1 %v2469_v41 }
 0x9e4   :  { %1927 = vmatprep.subr.mxu1 %v2992_v48 }
 0x9e5   :  { %1928 = vmatpush3.msra.mxu1 %v2476_v42 }
 0x9e6   :  { %1929 = vmatprep.subr.mxu1 %v2992_v48 }
 0x9e7   :  { %1930 = vmatpush3.msra.mxu1 %v2483_v43 }
 0x9e8   :  { %1931 = vmatprep.subr.mxu1 %v2992_v48 }
 0x9e9   :  { %1932 = vmatpush3.msra.mxu1 %v2490_v44 }
 0x9ea   :  { %1933 = vmatprep.subr.mxu1 %v2992_v48 }
 0x9eb   :  { %1934 = vmatpush3.msra.mxu1 %v2497_v46 }
 0x9ec   :  { %1935 = vmatprep.subr.mxu1 %v2992_v48 }
 0x9ed   :  { %1936 = vmatpush3.msra.mxu1 %v2513_v58 }
 0x9ee   :  { %1937 = vmatprep.subr.mxu1 %v2992_v48 }
 0x9ef   :  { %1938 = vmatpush3.msra.mxu1 %v2520_v59 }
 0x9f0   :  { %1939 = vmatprep.subr.mxu1 %v2992_v48 }
 0x9f1   :  { %1940 = vmatpush3.msra.mxu1 %v2527_v63 }
 0x9f2   :  { %1941 = vmatprep.subr.mxu1 %v2992_v48 }
 0x9f3   :  { %1942 = vmatpush3.msra.mxu1 %v2532_v33 }
 0x9f4   :  { %1943 = vmatprep.subr.mxu1 %v2992_v48 }
 0x9f5   :  { %1944 = vmatpush3.msra.mxu1 %v2539_v35 }
 0x9f6   :  { %1945 = vmatprep.subr.mxu1 %v2992_v48 }
 0x9f7   :  { %1946 = vmatpush3.msra.mxu1 %v2998_v45 }
 0x9f8   :  { %1947 = vmatprep.subr.mxu1 %v2992_v48 }
 0x9f9   :  { %1948 = vmatpush3.msra.mxu1 %v2999_v32 }
 0x9fa   :  { %1949 = vmatprep.subr.mxu1 %v2992_v48 }
 0x9fb   :  { %1950 = vmatpush3.msra.mxu1 %v3000_v51 }
 0x9fc   :  { %1951 = vmatprep.subr.mxu1 %v2992_v48 }
 0x9fd   :  { %1952 = vmatpush3.msra.mxu1 %v3001_v34 }
 0x9fe   :  { %1956 = vmatprep.subr.mxu1 %v2992_v48 }
 0xa9e   :  { %v750_v47 = vpop.f32.mrf.mxu1 }
 0xa9f   :  { %v751_v32 = vadd.f32 %v750_v47, %v3002_v57 }
 0xaa0   :  { %v752_v49 = vpop.f32.mrf.mxu1 }
 0xaa1   :  { %v753_v37 = vadd.f32 %v752_v49, %v2378_v39 }
 0xaa3   :  { %2091 = vtanh.f32 %v753_v37 }
 0xaa4   :  { %2093 = vtanh.f32 %v751_v32 }
 0xab0   :  { %v2092_v30 = vpop.eup %2091 }
 0xab1   :  { %763 = vrot.lane.b32.xlu1 %v2092_v30, %s2202_s26  ;;  %v2094_v45 = vpop.eup %2093  ;;  %v758_v37 = vmul.f32 0.5, %v2092_v30 }
 0xab2   :  { %v757_v35 = vmul.f32 0.5, %v2094_v45 }
 0xab3   :  { %v760_v47 = vadd.f32 0.5, %v758_v37 }
 0xab4   :  { %v759_v51 = vadd.f32 0.5, %v757_v35 }
 0xab6   :  { %v761_v34 = vmul.f32 %v759_v51, %v2634_v36 }
 0xb23   :  { %v764_v33 = vpop.permute.xlu1 %763 }
 0xb24   :  { %v766_v63 = vmul.f32 %v764_v33, %v759_v51 }
 0xb26   :  { %768 = vrot.lane.b32.xlu1 %v766_v63, %s2202_s26  ;;  %v3013_v63 = vld [vmem:[#allocation12_spill] sm:$0xff] }
 0xb98   :  { %v769_v59 = vpop.permute.xlu1 %768 }
 0xb99   :  { %v2738_v58 = vadd.f32 %v769_v59, %v761_v34 }
 0xb9b   :  { %2095 = vtanh.f32 %v2738_v58 }
 0xba8   :  { %v2096_v49 = vpop.eup %2095 }
 0xba9   :  { %774 = vrot.lane.b32.xlu0 %v2096_v49, %s2202_s26 }
 0xc1b   :  { %v775_v32 = vpop.permute.xlu0 %774 }
 0xc1c   :  { %v2742_v57 = vmul.f32 %v775_v32, %v760_v47 }
 0xc1e   :  { %1919 = vmatmul.mubr.msk.f32.vlgmr.msra.gmra.mxu0 %vm270_vm1, %v2742_v57 }
 0xc1f   :  { %938 = vmatpush1.msra.mxu0 %v2242_v2  ;;  %1001 = vmatprep.mubr.f32.mxu0 %v2992_v48  ;;  %v3003_v2 = vld [vmem:[#allocation8_spill] sm:$0xff] }
 0xc20   :  { %939 = vmatprep.subr.mxu0 %v2244_v3 }
 0xc21   :  { %940 = vmatpush1.msra.mxu0 %v2247_v4 }
 0xc22   :  { %941 = vmatprep.subr.mxu0 %v2250_v5 }
 0xc23   :  { %942 = vmatpush1.msra.mxu0 %v2253_v6 }
 0xc24   :  { %943 = vmatprep.subr.mxu0 %v2256_v7 }
 0xc25   :  { %944 = vmatpush1.msra.mxu0 %v2259_v8 }
 0xc26   :  { %945 = vmatprep.subr.mxu0 %v2262_v9 }
 0xc27   :  { %946 = vmatpush1.msra.mxu0 %v2265_v10 }
 0xc28   :  { %947 = vmatprep.subr.mxu0 %v2268_v11 }
 0xc29   :  { %948 = vmatpush1.msra.mxu0 %v2271_v12 }
 0xc2a   :  { %949 = vmatprep.subr.mxu0 %v2274_v13 }
 0xc2b   :  { %950 = vmatpush1.msra.mxu0 %v2277_v14 }
 0xc2c   :  { %951 = vmatprep.subr.mxu0 %v2280_v15 }
 0xc2d   :  { %952 = vmatpush1.msra.mxu0 %v2283_v16 }
 0xc2e   :  { %953 = vmatprep.subr.mxu0 %v2286_v17 }
 0xc2f   :  { %954 = vmatpush1.msra.mxu0 %v2289_v18 }
 0xc30   :  { %955 = vmatprep.subr.mxu0 %v2292_v19  ;;  %v3005_v19 = vld [vmem:[#allocation16_spill] sm:$0xff] }
 0xc31   :  { %956 = vmatpush1.msra.mxu0 %v2295_v20  ;;  %v3006_v20 = vld [vmem:[#allocation17_spill] sm:$0xff] }
 0xc32   :  { %957 = vmatprep.subr.mxu0 %v2298_v21  ;;  %v3007_v21 = vld [vmem:[#allocation18_spill] sm:$0xff] }
 0xc33   :  { %958 = vmatpush1.msra.mxu0 %v2301_v22  ;;  %v3008_v22 = vld [vmem:[#allocation19_spill] sm:$0xff] }
 0xc34   :  { %959 = vmatprep.subr.mxu0 %v2304_v23  ;;  %v3009_v23 = vld [vmem:[#allocation20_spill] sm:$0xff] }
 0xc35   :  { %960 = vmatpush1.msra.mxu0 %v2307_v24  ;;  %v3010_v24 = vld [vmem:[#allocation21_spill] sm:$0xff] }
 0xc36   :  { %961 = vmatprep.subr.mxu0 %v2310_v25  ;;  %v3011_v25 = vld [vmem:[#allocation22_spill] sm:$0xff] }
 0xc37   :  { %962 = vmatpush1.msra.mxu0 %v2313_v26  ;;  %v3012_v26 = vld [vmem:[#allocation23_spill] sm:$0xff] }
 0xc38   :  { %963 = vmatprep.subr.mxu0 %v2316_v27 }
 0xc39   :  { %964 = vmatpush1.msra.mxu0 %v2319_v28 }
 0xc3a   :  { %965 = vmatprep.subr.mxu0 %v2322_v29 }
 0xc3b   :  { %966 = vmatpush1.msra.mxu0 %v3003_v2  ;;  %v2121_v2 = vld [vmem:[#allocation2 + $0xf0] sm:$0xff] }
 0xc3c   :  { %967 = vmatprep.subr.mxu0 %v2994_v60 }
 0xc3d   :  { %968 = vmatpush1.msra.mxu0 %v2995_v50 }
 0xc3e   :  { %1975 = vmatprep.subr.mxu0 %v2992_v48 }
 0xcde   :  { %v847_v3 = vpop.f32.mrf.mxu0 }
 0xcdf   :  { %v848_v4 = vadd.f32 %v847_v3, %v2996_v31  ;;  %v2123_v3 = vld [vmem:[#allocation2 + $0xe0] sm:$0xff] }
 0xce0   :  { %v1920_v5 = vpop.f32.mrf.mxu0 }
 0xce1   :  { %v851_v6 = vsel %vm344_vm2, %v848_v4, -inf  ;;  %v2125_v5 = vld [vmem:[#allocation2 + $0xd0] sm:$0xff] }
 0xce2   :  { %852 = vmax.xlane.f32.xlu1 %v851_v6  ;;  %v2126_v6 = vld [vmem:[#allocation2 + $0xc8] sm:$0xff] }
 0xd6b   :  { %v853_v7 = vpop.xlane.xlu1 %852 }
 0xd6c   :  { %v854_v8 = vsub.f32 %v848_v4, %v853_v7  ;;  %v2124_v4 = vld [vmem:[#allocation2 + $0xd8] sm:$0xff]  ;;  %v2127_v7 = vld [vmem:[#allocation2 + $0xc0] sm:$0xff] }
 0xd6e   :  { %v855_v9 = vmul.f32 1.442695, %v854_v8  ;;  %v2128_v8 = vld [vmem:[#allocation2 + $0xb8] sm:$0xff] }
 0xd70   :  { %2097 = vpow2.f32 %v855_v9  ;;  %v2129_v9 = vld [vmem:[#allocation2 + $0xb0] sm:$0xff] }
 0xd7d   :  { %v2098_v10 = vpop.eup %2097 }
 0xd7e   :  { %1954 = vmatmul.mubr.f32.vlgmr.msra.gmra.mxu1 %v2098_v10  ;;  %v857_v11 = vsel %vm344_vm2, %v2098_v10, 0.0  ;;  %v2130_v10 = vld [vmem:[#allocation2 + $0xa8] sm:$0xff] }
 0xd7f   :  { %858 = vadd.xlane.f32.xlu0 %v857_v11  ;;  %1957 = vmatpush3.msra.mxu1 %v2389_v52  ;;  %v2131_v11 = vld [vmem:[#allocation2 + $0xa0] sm:$0xff] }
 0xd80   :  { %1958 = vmatprep.subr.mxu1 %v2992_v48  ;;  %1972 = vmatprep.mubr.msk.f32.mxu1 %vm2203_vm0, %v2992_v48 }
 0xd81   :  { %1959 = vmatpush3.msra.mxu1 %v2394_v53 }
 0xd82   :  { %1960 = vmatprep.subr.mxu1 %v2992_v48 }
 0xd83   :  { %1961 = vmatpush3.msra.mxu1 %v2401_v54 }
 0xd84   :  { %1962 = vmatprep.subr.mxu1 %v2992_v48 }
 0xd85   :  { %1963 = vmatpush3.msra.mxu1 %v2408_v55 }
 0xd86   :  { %1964 = vmatprep.subr.mxu1 %v2992_v48 }
 0xd87   :  { %1965 = vmatpush3.msra.mxu1 %v2415_v56 }
 0xd88   :  { %1966 = vmatprep.subr.mxu1 %v2992_v48 }
 0xd89   :  { %1967 = vmatpush3.msra.mxu1 %v2997_v0 }
 0xd8a   :  { %1968 = vmatprep.subr.mxu1 %v2992_v48 }
 0xd8b   :  { %1969 = vmatpush3.msra.mxu1 %v2433_v61 }
 0xd8c   :  { %1970 = vmatprep.subr.mxu1 %v2992_v48 }
 0xd8d   :  { %1971 = vmatpush3.msra.mxu1 %v2441_v62 }
 0xd8e   :  { %1190 = vmatprep.subr.mxu1 %v2240_v1  ;;  %v3004_v1 = vld [vmem:[#allocation15_spill] sm:$0xff] }
 0xe08   :  { %v859_v12 = vpop.xlane.xlu0 %858 }
 0xe09   :  { %2099 = vrcp.f32 %v859_v12  ;;  %v2132_v12 = vld [vmem:[#allocation2 + $0x98] sm:$0xff] }
 0xe16   :  { %v2100_v13 = vpop.eup %2099 }
 0xe3e   :  { %v926_v14 = vpop.f32.mrf.mxu1 }
 0xe3f   :  { %v931_v15 = vmul.f32 %v2100_v13, %v926_v14  ;;  %v2133_v13 = vld [vmem:[#allocation2 + $0x90] sm:$0xff]  ;;  %v2134_v14 = vld [vmem:[#allocation2 + $0x88] sm:$0xff] }
 0xe40   :  { %v1955_v16 = vpop.f32.mrf.mxu1 }
 0xe41   :  { %933 = vrot.lane.b32.xlu0 %v931_v15, %s2202_s26  ;;  %v2135_v15 = vld [vmem:[#allocation2 + $0x80] sm:$0xff]  ;;  %v2136_v16 = vld [vmem:[#allocation2 + $0x78] sm:$0xff] }
 0xeb3   :  { %v934_v17 = vpop.permute.xlu0 %933 }
 0xeb4   :  { %v936_v18 = vsel %vm270_vm1, %v2742_v57, %v934_v17  ;;  %v2137_v17 = vld [vmem:[#allocation2 + $0x70] sm:$0xff] }
 0xeb5   :  { %1002 = vmatmul.mubr.f32.vlgmr.msra.gmra.mxu0 %v936_v18  ;;  %v2138_v18 = vld [vmem:[#allocation2 + $0x68] sm:$0xff] }
 0xeb6   :  { %1976 = vmatpush3.msra.mxu0 %v2457_v38  ;;  %2007 = vmatprep.mubr.msk.f32.mxu0 %vm2203_vm0, %v2992_v48 }
 0xeb7   :  { %1977 = vmatprep.subr.mxu0 %v2992_v48 }
 0xeb8   :  { %1978 = vmatpush3.msra.mxu0 %v2462_v40 }
 0xeb9   :  { %1979 = vmatprep.subr.mxu0 %v2992_v48 }
 0xeba   :  { %1980 = vmatpush3.msra.mxu0 %v2469_v41 }
 0xebb   :  { %1981 = vmatprep.subr.mxu0 %v2992_v48 }
 0xebc   :  { %1982 = vmatpush3.msra.mxu0 %v2476_v42 }
 0xebd   :  { %1983 = vmatprep.subr.mxu0 %v2992_v48 }
 0xebe   :  { %1984 = vmatpush3.msra.mxu0 %v2483_v43 }
 0xebf   :  { %1985 = vmatprep.subr.mxu0 %v2992_v48 }
 0xec0   :  { %1986 = vmatpush3.msra.mxu0 %v2490_v44 }
 0xec1   :  { %1987 = vmatprep.subr.mxu0 %v2992_v48 }
 0xec2   :  { %1988 = vmatpush3.msra.mxu0 %v2497_v46 }
 0xec3   :  { %1989 = vmatprep.subr.mxu0 %v2992_v48 }
 0xec4   :  { %1990 = vmatpush3.msra.mxu0 %v3004_v1 }
 0xec5   :  { %1991 = vmatprep.subr.mxu0 %v2992_v48 }
 0xec6   :  { %1992 = vmatpush3.msra.mxu0 %v3005_v19 }
 0xec7   :  { %1993 = vmatprep.subr.mxu0 %v2992_v48 }
 0xec8   :  { %1994 = vmatpush3.msra.mxu0 %v3006_v20 }
 0xec9   :  { %1995 = vmatprep.subr.mxu0 %v2992_v48 }
 0xeca   :  { %1996 = vmatpush3.msra.mxu0 %v3007_v21 }
 0xecb   :  { %1997 = vmatprep.subr.mxu0 %v2992_v48 }
 0xecc   :  { %1998 = vmatpush3.msra.mxu0 %v3008_v22 }
 0xecd   :  { %1999 = vmatprep.subr.mxu0 %v2992_v48 }
 0xece   :  { %2000 = vmatpush3.msra.mxu0 %v3009_v23 }
 0xecf   :  { %2001 = vmatprep.subr.mxu0 %v2992_v48 }
 0xed0   :  { %2002 = vmatpush3.msra.mxu0 %v3010_v24 }
 0xed1   :  { %2003 = vmatprep.subr.mxu0 %v2992_v48 }
 0xed2   :  { %2004 = vmatpush3.msra.mxu0 %v3011_v25 }
 0xed3   :  { %2005 = vmatprep.subr.mxu0 %v2992_v48 }
 0xed4   :  { %2006 = vmatpush3.msra.mxu0 %v3012_v26 }
 0xed5   :  { %2010 = vmatprep.subr.mxu0 %v2992_v48 }
 0xf75   :  { %v1003_v27 = vpop.f32.mrf.mxu0 }
 0xf76   :  { %v1004_v33 = vadd.f32 %v1003_v27, %v3013_v63  ;;  %v2139_v27 = vld [vmem:[#allocation2 + $0x60] sm:$0xff] }
 0xf77   :  { %v1005_v28 = vpop.f32.mrf.mxu0 }
 0xf78   :  { %v1006_v29 = vadd.f32 %v1005_v28, %v2378_v39  ;;  %v2140_v28 = vld [vmem:[#allocation2 + $0x58] sm:$0xff] }
 0xf7a   :  { %2101 = vtanh.f32 %v1006_v29  ;;  %v2141_v29 = vld [vmem:[#allocation2 + $0x50] sm:$0xff] }
 0xf7b   :  { %2103 = vtanh.f32 %v1004_v33  ;;  %v2143_v33 = vld [vmem:[#allocation2 + $0x40] sm:$0xff] }
 0xf87   :  { %v2102_v59 = vpop.eup %2101 }
 0xf88   :  { %1016 = vrot.lane.b32.xlu1 %v2102_v59, %s2202_s26  ;;  %v2104_v35 = vpop.eup %2103  ;;  %v1011_v49 = vmul.f32 0.5, %v2102_v59  ;;  %v2142_v59 = vld [vmem:[#allocation2 + $0x48] sm:$0xff] }
 0xf89   :  { %v1010_v36 = vmul.f32 0.5, %v2104_v35  ;;  %v2144_v35 = vld [vmem:[#allocation2 + $0x38] sm:$0xff] }
 0xf8a   :  { %v1013_v37 = vadd.f32 0.5, %v1011_v49 }
 0xf8b   :  { %v1012_v60 = vadd.f32 0.5, %v1010_v36  ;;  %v2145_v36 = vld [vmem:[#allocation2 + $0x30] sm:$0xff] }
 0xf8d   :  { %v1014_v51 = vmul.f32 %v1012_v60, %v2738_v58  ;;  %v2122_v58 = vld [vmem:[#allocation2 + $0xe8] sm:$0xff] }
 0xffa   :  { %v1017_v50 = vpop.permute.xlu1 %1016 }
 0xffb   :  { %v1019_v45 = vmul.f32 %v1017_v50, %v1012_v60  ;;  %v2146_v60 = vld [vmem:[#allocation2 + $0x28] sm:$0xff]  ;;  %v2147_v50 = vld [vmem:[#allocation2 + $0x20] sm:$0xff] }
 0xffd   :  { %1021 = vrot.lane.b32.xlu1 %v1019_v45, %s2202_s26  ;;  %v2148_v45 = vld [vmem:[#allocation2 + $0x18] sm:$0xff] }
0x106f   :  { %v1022_v34 = vpop.permute.xlu1 %1021 }
0x1070   :  { %v2842_v30 = vadd.f32 %v1022_v34, %v1014_v51  ;;  %v2149_v51 = vld [vmem:[#allocation2 + $0x10] sm:$0xff]  ;;  %v2150_v34 = vld [vmem:[#allocation2 + $0x8] sm:$0xff] }
0x1072   :  { %2105 = vtanh.f32 %v2842_v30 }
0x107f   :  { %v2106_v57 = vpop.eup %2105 }
0x1080   :  { %1027 = vrot.lane.b32.xlu0 %v2106_v57, %s2202_s26  ;;  %v2151_v57 = vld [vmem:[#allocation2] sm:$0xff] }
0x10f2   :  { %v1028_v47 = vpop.permute.xlu0 %1027 }
0x10f3   :  { %v2846_v32 = vmul.f32 %v1028_v47, %v1013_v37 }
0x10f5   :  { %1973 = vmatmul.mubr.msk.f32.vlgmr.msra.gmra.mxu1 %vm270_vm1, %v2846_v32 }
0x10f6   :  { %1191 = vmatpush1.msra.mxu1 %v2121_v2  ;;  %1254 = vmatprep.mubr.f32.mxu1 %v2992_v48 }
0x10f7   :  { %1192 = vmatprep.subr.mxu1 %v2122_v58 }
0x10f8   :  { %1193 = vmatpush1.msra.mxu1 %v2123_v3 }
0x10f9   :  { %1194 = vmatprep.subr.mxu1 %v2124_v4 }
0x10fa   :  { %1195 = vmatpush1.msra.mxu1 %v2125_v5 }
0x10fb   :  { %1196 = vmatprep.subr.mxu1 %v2126_v6 }
0x10fc   :  { %1197 = vmatpush1.msra.mxu1 %v2127_v7 }
0x10fd   :  { %1198 = vmatprep.subr.mxu1 %v2128_v8 }
0x10fe   :  { %1199 = vmatpush1.msra.mxu1 %v2129_v9 }
0x10ff   :  { %1200 = vmatprep.subr.mxu1 %v2130_v10 }
0x1100   :  { %1201 = vmatpush1.msra.mxu1 %v2131_v11 }
0x1101   :  { %1202 = vmatprep.subr.mxu1 %v2132_v12 }
0x1102   :  { %1203 = vmatpush1.msra.mxu1 %v2133_v13  ;;  %v122_v13 = vld [vmem:[#allocation2 + $0x1f0] sm:$0xff] }
0x1103   :  { %1204 = vmatprep.subr.mxu1 %v2134_v14  ;;  %v121_v14 = vld [vmem:[#allocation2 + $0x1e8] sm:$0xff] }
0x1104   :  { %1205 = vmatpush1.msra.mxu1 %v2135_v15  ;;  %v120_v15 = vld [vmem:[#allocation2 + $0x1e0] sm:$0xff] }
0x1105   :  { %1206 = vmatprep.subr.mxu1 %v2136_v16  ;;  %v119_v16 = vld [vmem:[#allocation2 + $0x1d8] sm:$0xff] }
0x1106   :  { %1207 = vmatpush1.msra.mxu1 %v2137_v17  ;;  %v118_v17 = vld [vmem:[#allocation2 + $0x1d0] sm:$0xff] }
0x1107   :  { %1208 = vmatprep.subr.mxu1 %v2138_v18  ;;  %v117_v18 = vld [vmem:[#allocation2 + $0x1c8] sm:$0xff] }
0x1108   :  { %1209 = vmatpush1.msra.mxu1 %v2139_v27  ;;  %v116_v27 = vld [vmem:[#allocation2 + $0x1c0] sm:$0xff] }
0x1109   :  { %1210 = vmatprep.subr.mxu1 %v2140_v28  ;;  %v115_v28 = vld [vmem:[#allocation2 + $0x1b8] sm:$0xff] }
0x110a   :  { %1211 = vmatpush1.msra.mxu1 %v2141_v29  ;;  %v114_v29 = vld [vmem:[#allocation2 + $0x1b0] sm:$0xff] }
0x110b   :  { %1212 = vmatprep.subr.mxu1 %v2142_v59  ;;  %v113_v59 = vld [vmem:[#allocation2 + $0x1a8] sm:$0xff] }
0x110c   :  { %1213 = vmatpush1.msra.mxu1 %v2143_v33  ;;  %v112_v33 = vld [vmem:[#allocation2 + $0x1a0] sm:$0xff] }
0x110d   :  { %1214 = vmatprep.subr.mxu1 %v2144_v35  ;;  %v111_v35 = vld [vmem:[#allocation2 + $0x198] sm:$0xff] }
0x110e   :  { %1215 = vmatpush1.msra.mxu1 %v2145_v36  ;;  %v110_v36 = vld [vmem:[#allocation2 + $0x190] sm:$0xff] }
0x110f   :  { %1216 = vmatprep.subr.mxu1 %v2146_v60  ;;  %v109_v60 = vld [vmem:[#allocation2 + $0x188] sm:$0xff] }
0x1110   :  { %1217 = vmatpush1.msra.mxu1 %v2147_v50  ;;  %v108_v50 = vld [vmem:[#allocation2 + $0x180] sm:$0xff] }
0x1111   :  { %1218 = vmatprep.subr.mxu1 %v2148_v45  ;;  %v107_v45 = vld [vmem:[#allocation2 + $0x178] sm:$0xff] }
0x1112   :  { %1219 = vmatpush1.msra.mxu1 %v2149_v51  ;;  %v106_v51 = vld [vmem:[#allocation2 + $0x170] sm:$0xff] }
0x1113   :  { %1220 = vmatprep.subr.mxu1 %v2150_v34  ;;  %v105_v34 = vld [vmem:[#allocation2 + $0x168] sm:$0xff] }
0x1114   :  { %1221 = vmatpush1.msra.mxu1 %v2151_v57  ;;  %v104_v57 = vld [vmem:[#allocation2 + $0x160] sm:$0xff] }
0x1115   :  { %2029 = vmatprep.subr.mxu1 %v2992_v48 }
0x11b5   :  { %v1100_v49 = vpop.f32.mrf.mxu1 }
0x11b6   :  { %v1101_v37 = vadd.f32 %v1100_v49, %v2996_v31  ;;  %v103_v49 = vld [vmem:[#allocation2 + $0x158] sm:$0xff] }
0x11b7   :  { %v1974_v47 = vpop.f32.mrf.mxu1 }
0x11b8   :  { %v1104_v2 = vsel %vm344_vm2, %v1101_v37, -inf  ;;  %v101_v47 = vld [vmem:[#allocation2 + $0x148] sm:$0xff] }
0x11b9   :  { %1105 = vmax.xlane.f32.xlu1 %v1104_v2  ;;  %v100_v2 = vld [vmem:[#allocation2 + $0x140] sm:$0xff] }
0x1242   :  { %v1106_v58 = vpop.xlane.xlu1 %1105 }
0x1243   :  { %v1107_v3 = vsub.f32 %v1101_v37, %v1106_v58  ;;  %v102_v37 = vld [vmem:[#allocation2 + $0x150] sm:$0xff]  ;;  %v99_v58 = vld [vmem:[#allocation2 + $0x138] sm:$0xff] }
0x1245   :  { %v1108_v4 = vmul.f32 1.442695, %v1107_v3  ;;  %v98_v3 = vld [vmem:[#allocation2 + $0x130] sm:$0xff] }
0x1247   :  { %2107 = vpow2.f32 %v1108_v4  ;;  %v97_v4 = vld [vmem:[#allocation2 + $0x128] sm:$0xff] }
0x1254   :  { %v2108_v5 = vpop.eup %2107 }
0x1255   :  { %2008 = vmatmul.mubr.f32.vlgmr.msra.gmra.mxu0 %v2108_v5  ;;  %v1110_v6 = vsel %vm344_vm2, %v2108_v5, 0.0  ;;  %v96_v5 = vld [vmem:[#allocation2 + $0x120] sm:$0xff] }
0x1256   :  { %1111 = vadd.xlane.f32.xlu0 %v1110_v6  ;;  %2011 = vmatpush3.msra.mxu0 %v2389_v52  ;;  %v95_v6 = vld [vmem:[#allocation2 + $0x118] sm:$0xff] }
0x1257   :  { %2012 = vmatprep.subr.mxu0 %v2992_v48  ;;  %2026 = vmatprep.mubr.msk.f32.mxu0 %vm2203_vm0, %v2992_v48 }
0x1258   :  { %2013 = vmatpush3.msra.mxu0 %v2394_v53 }
0x1259   :  { %2014 = vmatprep.subr.mxu0 %v2992_v48 }
0x125a   :  { %2015 = vmatpush3.msra.mxu0 %v2401_v54 }
0x125b   :  { %2016 = vmatprep.subr.mxu0 %v2992_v48 }
0x125c   :  { %2017 = vmatpush3.msra.mxu0 %v2408_v55 }
0x125d   :  { %2018 = vmatprep.subr.mxu0 %v2992_v48 }
0x125e   :  { %2019 = vmatpush3.msra.mxu0 %v2415_v56 }
0x125f   :  { %2020 = vmatprep.subr.mxu0 %v2992_v48 }
0x1260   :  { %2021 = vmatpush3.msra.mxu0 %v2997_v0 }
0x1261   :  { %2022 = vmatprep.subr.mxu0 %v2992_v48 }
0x1262   :  { %2023 = vmatpush3.msra.mxu0 %v2433_v61 }
0x1263   :  { %2024 = vmatprep.subr.mxu0 %v2992_v48 }
0x1264   :  { %2025 = vmatpush3.msra.mxu0 %v2441_v62 }
0x12df   :  { %v1112_v52 = vpop.xlane.xlu0 %1111 }
0x12e0   :  { %2109 = vrcp.f32 %v1112_v52  ;;  %v94_v52 = vld [vmem:[#allocation2 + $0x110] sm:$0xff] }
0x12ed   :  { %v2110_v53 = vpop.eup %2109 }
0x1315   :  { %v1179_v54 = vpop.f32.mrf.mxu0 }
0x1316   :  { %v1184_v55 = vmul.f32 %v2110_v53, %v1179_v54  ;;  %v93_v53 = vld [vmem:[#allocation2 + $0x108] sm:$0xff] }
0x1317   :  { %v2009_v31 = vpop.f32.mrf.mxu0 }
0x1318   :  { %1186 = vrot.lane.b32.xlu0 %v1184_v55, %s2202_s26  ;;  %v92_v55 = vld [vmem:[#allocation2 + $0x100] sm:$0xff]  ;;  %v155_v31 = vld [vmem:[#allocation2 + $0x3f0] sm:$0xff] }
0x138a   :  { %v1187_v56 = vpop.permute.xlu0 %1186 }
0x138b   :  { %v1189_v0 = vsel %vm270_vm1, %v2846_v32, %v1187_v56  ;;  %v139_v56 = vld [vmem:[#allocation2 + $0x2f0] sm:$0xff] }
0x138c   :  { %1255 = vmatmul.mubr.f32.vlgmr.msra.gmra.mxu1 %v1189_v0  ;;  %v154_v0 = vld [vmem:[#allocation2 + $0x3e0] sm:$0xff] }
0x138d   :  { %2030 = vmatpush3.msra.mxu1 %v2457_v38  ;;  %2061 = vmatprep.mubr.msk.f32.mxu1 %vm2203_vm0, %v2992_v48 }
0x138e   :  { %2031 = vmatprep.subr.mxu1 %v2992_v48 }
0x138f   :  { %2032 = vmatpush3.msra.mxu1 %v2462_v40 }
0x1390   :  { %2033 = vmatprep.subr.mxu1 %v2992_v48 }
0x1391   :  { %2034 = vmatpush3.msra.mxu1 %v2469_v41 }
0x1392   :  { %2035 = vmatprep.subr.mxu1 %v2992_v48 }
0x1393   :  { %2036 = vmatpush3.msra.mxu1 %v2476_v42 }
0x1394   :  { %2037 = vmatprep.subr.mxu1 %v2992_v48 }
0x1395   :  { %2038 = vmatpush3.msra.mxu1 %v2483_v43 }
0x1396   :  { %2039 = vmatprep.subr.mxu1 %v2992_v48 }
0x1397   :  { %2040 = vmatpush3.msra.mxu1 %v2490_v44 }
0x1398   :  { %2041 = vmatprep.subr.mxu1 %v2992_v48 }
0x1399   :  { %2042 = vmatpush3.msra.mxu1 %v2497_v46 }
0x139a   :  { %2043 = vmatprep.subr.mxu1 %v2992_v48 }
0x139b   :  { %2044 = vmatpush3.msra.mxu1 %v3004_v1 }
0x139c   :  { %2045 = vmatprep.subr.mxu1 %v2992_v48 }
0x139d   :  { %2046 = vmatpush3.msra.mxu1 %v3005_v19 }
0x139e   :  { %2047 = vmatprep.subr.mxu1 %v2992_v48 }
0x139f   :  { %2048 = vmatpush3.msra.mxu1 %v3006_v20 }
0x13a0   :  { %2049 = vmatprep.subr.mxu1 %v2992_v48 }
0x13a1   :  { %2050 = vmatpush3.msra.mxu1 %v3007_v21 }
0x13a2   :  { %2051 = vmatprep.subr.mxu1 %v2992_v48 }
0x13a3   :  { %2052 = vmatpush3.msra.mxu1 %v3008_v22 }
0x13a4   :  { %2053 = vmatprep.subr.mxu1 %v2992_v48 }
0x13a5   :  { %2054 = vmatpush3.msra.mxu1 %v3009_v23 }
0x13a6   :  { %2055 = vmatprep.subr.mxu1 %v2992_v48 }
0x13a7   :  { %2056 = vmatpush3.msra.mxu1 %v3010_v24 }
0x13a8   :  { %2057 = vmatprep.subr.mxu1 %v2992_v48 }
0x13a9   :  { %2058 = vmatpush3.msra.mxu1 %v3011_v25 }
0x13aa   :  { %2059 = vmatprep.subr.mxu1 %v2992_v48 }
0x13ab   :  { %2060 = vmatpush3.msra.mxu1 %v3012_v26 }
0x13ac   :  { %1759 = vmatprep.subr.mxu1 %v155_v31 }
0x144c   :  { %v1256_v61 = vpop.f32.mrf.mxu1 }
0x144d   :  { %v1257_v41 = vadd.f32 %v1256_v61, %v3013_v63  ;;  %v2152_v63 = vld [vmem:[%s2938_s2] sm:$0x3] }
0x144e   :  { %v1258_v62 = vpop.f32.mrf.mxu1  ;;  %v138_v61 = vld [vmem:[#allocation2 + $0x2e0] sm:$0xff] }
0x144f   :  { %v1259_v38 = vadd.f32 %v1258_v62, %v2378_v39  ;;  %v153_v62 = vld [vmem:[#allocation2 + $0x3d0] sm:$0xff] }
0x1451   :  { %2111 = vtanh.f32 %v1259_v38  ;;  %v137_v38 = vld [vmem:[#allocation2 + $0x2d0] sm:$0xff] }
0x1452   :  { %2113 = vtanh.f32 %v1257_v41  ;;  %v136_v41 = vld [vmem:[#allocation2 + $0x2c0] sm:$0xff] }
0x145e   :  { %v2112_v40 = vpop.eup %2111 }
0x145f   :  { %1269 = vrot.lane.b32.xlu1 %v2112_v40, %s2202_s26  ;;  %v2114_v42 = vpop.eup %2113  ;;  %v1264_v22 = vmul.f32 0.5, %v2112_v40  ;;  %v152_v40 = vld [vmem:[#allocation2 + $0x3c0] sm:$0xff] }
0x1460   :  { %v1263_v43 = vmul.f32 0.5, %v2114_v42  ;;  %v151_v42 = vld [vmem:[#allocation2 + $0x3b0] sm:$0xff] }
0x1461   :  { %v1266_v23 = vadd.f32 0.5, %v1264_v22  ;;  %v133_v22 = vld [vmem:[#allocation2 + $0x290] sm:$0xff] }
0x1462   :  { %v1265_v44 = vadd.f32 0.5, %v1263_v43  ;;  %v135_v43 = vld [vmem:[#allocation2 + $0x2b0] sm:$0xff] }
0x1464   :  { %v1267_v19 = vmul.f32 %v1265_v44, %v2842_v30 }
0x14d1   :  { %v1270_v46 = vpop.permute.xlu1 %1269 }
0x14d2   :  { %v1272_v1 = vmul.f32 %v1270_v46, %v1265_v44  ;;  %v150_v44 = vld [vmem:[#allocation2 + $0x3a0] sm:$0xff] }
0x14d4   :  { %1274 = vrot.lane.b32.xlu1 %v1272_v1, %s2202_s26 }
0x1546   :  { %v1275_v20 = vpop.permute.xlu1 %1274 }
0x1547   :  { %v1277_v21 = vadd.f32 %v1275_v20, %v1267_v19  ;;  %v134_v19 = vld [vmem:[#allocation2 + $0x2a0] sm:$0xff] }
0x1549   :  { %2115 = vtanh.f32 %v1277_v21  ;;  %v149_v21 = vld [vmem:[#allocation2 + $0x390] sm:$0xff] }
0x1556   :  { %v2116_v39 = vpop.eup %2115 }
0x1557   :  { %1280 = vrot.lane.b32.xlu0 %v2116_v39, %s2202_s26 }
0x15c9   :  { %v1281_v24 = vpop.permute.xlu0 %1280 }
0x15ca   :  { %v2914_v25 = vmul.f32 %v1281_v24, %v1266_v23  ;;  %v148_v23 = vld [vmem:[#allocation2 + $0x380] sm:$0xff] }
0x15cb   :  { %v132_v24 = vld [vmem:[#allocation2 + $0x280] sm:$0xff] }
0x15cc   :  { %2027 = vmatmul.mubr.msk.f32.vlgmr.msra.gmra.mxu0 %vm270_vm1, %v2914_v25 }
0x15cd   :  { %1525 = vmatprep.mubr.f32.mxu0 %v2992_v48  ;;  %v123_v48 = vld [vmem:[#allocation2 + $0x1f8] sm:$0xff] }
0x15ce   :  { %1461 = vmatprep.subr.mxu0 %v123_v48  ;;  %v143_v48 = vld [vmem:[#allocation2 + $0x330] sm:$0xff] }
0x15cf   :  { %1462 = vmatpush1.msra.mxu0 %v122_v13  ;;  %v127_v13 = vld [vmem:[#allocation2 + $0x230] sm:$0xff] }
0x15d0   :  { %1463 = vmatprep.subr.mxu0 %v121_v14  ;;  %v142_v14 = vld [vmem:[#allocation2 + $0x320] sm:$0xff] }
0x15d1   :  { %1464 = vmatpush1.msra.mxu0 %v120_v15  ;;  %v126_v15 = vld [vmem:[#allocation2 + $0x220] sm:$0xff] }
0x15d2   :  { %1465 = vmatprep.subr.mxu0 %v119_v16  ;;  %v141_v16 = vld [vmem:[#allocation2 + $0x310] sm:$0xff] }
0x15d3   :  { %1466 = vmatpush1.msra.mxu0 %v118_v17  ;;  %v125_v17 = vld [vmem:[#allocation2 + $0x210] sm:$0xff] }
0x15d4   :  { %1467 = vmatprep.subr.mxu0 %v117_v18  ;;  %v140_v18 = vld [vmem:[#allocation2 + $0x300] sm:$0xff] }
0x15d5   :  { %1468 = vmatpush1.msra.mxu0 %v116_v27  ;;  %v124_v27 = vld [vmem:[#allocation2 + $0x200] sm:$0xff] }
0x15d6   :  { %1469 = vmatprep.subr.mxu0 %v115_v28  ;;  %v3014_v28 = vld [vmem:[#allocation11_spill] sm:$0xff] }
0x15d7   :  { %1470 = vmatpush1.msra.mxu0 %v114_v29  ;;  %v1445_v29 = vsub.s32 1, %v3014_v28 }
0x15d8   :  { %1471 = vmatprep.subr.mxu0 %v113_v59  ;;  %v2153_v59 = vld [vmem:[%s2940_s4] sm:$0x77]  ;;  %s2174_s4 = scalar_lea.vmem %s1616_s27, 32 }
0x15d9   :  { %1472 = vmatpush1.msra.mxu0 %v112_v33  ;;  %v1446_v33 = vrot.slane %v2153_v59, %v1445_v29  ;;  %p2175_p5 = scmp.ne.s32.totalorder %s1616_s27, %s2174_s4  ;;  %p2180_p7 = scmp.lt.s32.totalorder %s2174_s4, %s2174_s4 }
0x15da   :  { %1473 = vmatprep.subr.mxu0 %v111_v35 }
0x15db   :  { %1474 = vmatpush1.msra.mxu0 %v110_v36  ;;  %v1456_v36 = vrot.slane %v1446_v33, %v1445_v29  ;;  %p2181_p8 = por %p2180_p7, %p2179_p6 }
0x15dc   :  { %1475 = vmatprep.subr.mxu0 %v109_v60 }
0x15dd   :  { %1476 = vmatpush1.msra.mxu0 %v108_v50  ;;  %p2182_p9 = pnand %p2181_p8, %p2175_p5 }
0x15de   :  { %1477 = vmatprep.subr.mxu0 %v107_v45 }
0x15df   :  { %1478 = vmatpush1.msra.mxu0 %v106_v51 }
0x15e0   :  { %1479 = vmatprep.subr.mxu0 %v105_v34 }
0x15e1   :  { %1480 = vmatpush1.msra.mxu0 %v104_v57 }
0x15e2   :  { %1481 = vmatprep.subr.mxu0 %v103_v49 }
0x15e3   :  { %1482 = vmatpush1.msra.mxu0 %v102_v37  ;;  %v1536_v37 = vsub.s32 2, %v3014_v28 }
0x15e4   :  { %1483 = vmatprep.subr.mxu0 %v101_v47 }
0x15e5   :  { %1484 = vmatpush1.msra.mxu0 %v100_v2  ;;  %v1537_v2 = vrot.slane %v2153_v59, %v1536_v37 }
0x15e6   :  { %1485 = vmatprep.subr.mxu0 %v99_v58 }
0x15e7   :  { %1486 = vmatpush1.msra.mxu0 %v98_v3 }
0x15e8   :  { %1487 = vmatprep.subr.mxu0 %v97_v4 }
0x15e9   :  { %1488 = vmatpush1.msra.mxu0 %v96_v5 }
0x15ea   :  { %1489 = vmatprep.subr.mxu0 %v95_v6 }
0x15eb   :  { %1490 = vmatpush1.msra.mxu0 %v94_v52 }
0x15ec   :  { %1491 = vmatprep.subr.mxu0 %v93_v53 }
0x15ed   :  { %1492 = vmatpush1.msra.mxu0 %v92_v55 }
0x168c   :  { %v1353_v26 = vpop.f32.mrf.mxu0 }
0x168d   :  { %v1354_v30 = vadd.f32 %v2152_v63, %v1353_v26  ;;  %v147_v26 = vld [vmem:[#allocation2 + $0x370] sm:$0xff] }
0x168e   :  { %v2028_v32 = vpop.f32.mrf.mxu0  ;;  %v131_v63 = vld [vmem:[#allocation2 + $0x270] sm:$0xff] }
0x168f   :  { %v1357_v7 = vsel %vm344_vm2, %v1354_v30, -inf  ;;  %v130_v32 = vld [vmem:[#allocation2 + $0x260] sm:$0xff] }
0x1690   :  { %1358 = vmax.xlane.f32.xlu1 %v1357_v7  ;;  %v145_v7 = vld [vmem:[#allocation2 + $0x350] sm:$0xff] }
0x1719   :  { %v1359_v8 = vpop.xlane.xlu1 %1358 }
0x171a   :  { %v1360_v9 = vsub.f32 %v1354_v30, %v1359_v8  ;;  %v146_v30 = vld [vmem:[#allocation2 + $0x360] sm:$0xff]  ;;  %v129_v8 = vld [vmem:[#allocation2 + $0x250] sm:$0xff] }
0x171c   :  { %v1361_v10 = vmul.f32 1.442695, %v1360_v9  ;;  %v144_v9 = vld [vmem:[#allocation2 + $0x340] sm:$0xff] }
0x171e   :  { %2117 = vpow2.f32 %v1361_v10  ;;  %v128_v10 = vld [vmem:[#allocation2 + $0x240] sm:$0xff] }
0x172b   :  { %v2118_v11 = vpop.eup %2117 }
0x172c   :  { %2062 = vmatmul.mubr.f32.vlgmr.msra.gmra.mxu1 %v2118_v11  ;;  %v1363_v12 = vsel %vm344_vm2, %v2118_v11, 0.0 }
0x172d   :  { %1364 = vadd.xlane.f32.xlu0 %v1363_v12  ;;  %1760 = vmatpush3.msra.mxu1 %v139_v56 }
0x172e   :  { %1761 = vmatprep.subr.mxu1 %v154_v0 }
0x172f   :  { %1762 = vmatpush3.msra.mxu1 %v138_v61 }
0x1730   :  { %1763 = vmatprep.subr.mxu1 %v153_v62 }
0x1731   :  { %1764 = vmatpush3.msra.mxu1 %v137_v38 }
0x1732   :  { %1765 = vmatprep.subr.mxu1 %v152_v40 }
0x1733   :  { %1766 = vmatpush3.msra.mxu1 %v136_v41 }
0x1734   :  { %1767 = vmatprep.subr.mxu1 %v151_v42 }
0x1735   :  { %1768 = vmatpush3.msra.mxu1 %v135_v43 }
0x1736   :  { %1769 = vmatprep.subr.mxu1 %v150_v44 }
0x1737   :  { %1770 = vmatpush3.msra.mxu1 %v134_v19 }
0x1738   :  { %1771 = vmatprep.subr.mxu1 %v149_v21 }
0x1739   :  { %1772 = vmatpush3.msra.mxu1 %v133_v22 }
0x173a   :  { %1773 = vmatprep.subr.mxu1 %v148_v23 }
0x173b   :  { %1774 = vmatpush3.msra.mxu1 %v132_v24 }
0x173c   :  { %1775 = vmatprep.subr.mxu1 %v147_v26 }
0x173d   :  { %1776 = vmatpush3.msra.mxu1 %v131_v63 }
0x173e   :  { %1777 = vmatprep.subr.mxu1 %v146_v30 }
0x173f   :  { %1778 = vmatpush3.msra.mxu1 %v130_v32 }
0x1740   :  { %1779 = vmatprep.subr.mxu1 %v145_v7 }
0x1741   :  { %1780 = vmatpush3.msra.mxu1 %v129_v8 }
0x1742   :  { %1781 = vmatprep.subr.mxu1 %v144_v9 }
0x1743   :  { %1782 = vmatpush3.msra.mxu1 %v128_v10 }
0x1744   :  { %1783 = vmatprep.subr.mxu1 %v143_v48 }
0x1745   :  { %1784 = vmatpush3.msra.mxu1 %v127_v13 }
0x1746   :  { %1785 = vmatprep.subr.mxu1 %v142_v14 }
0x1747   :  { %1786 = vmatpush3.msra.mxu1 %v126_v15 }
0x1748   :  { %1787 = vmatprep.subr.mxu1 %v141_v16 }
0x1749   :  { %1788 = vmatpush3.msra.mxu1 %v125_v17 }
0x174a   :  { %1789 = vmatprep.subr.mxu1 %v140_v18 }
0x174b   :  { %1790 = vmatpush3.msra.mxu1 %v124_v27 }
0x17b6   :  { %v1365_v54 = vpop.xlane.xlu0 %1364 }
0x17b7   :  { %2119 = vrcp.f32 %v1365_v54 }
0x17c4   :  { %v2120_v46 = vpop.eup %2119 }
0x17ec   :  { %v1432_v1 = vpop.f32.mrf.mxu1 }
0x17ed   :  { %v1437_v20 = vmul.f32 %v2120_v46, %v1432_v1 }
0x17ee   :  { %v2063_v39 = vpop.f32.mrf.mxu1 }
0x17ef   :  { %1439 = vrot.lane.b32.xlu0 %v1437_v20, %s2202_s26 }
0x1861   :  { %v1440_v11 = vpop.permute.xlu0 %1439 }
0x1862   :  { %v1442_v12 = vsel %vm270_vm1, %v2914_v25, %v1440_v11  ;;  %v1449_v25 = vsub.s32 5, %v3014_v28 }
0x1863   :  { %1526 = vmatmul.mubr.f32.vlgmr.msra.gmra.mxu0 %v1442_v12 }
0x1864   :  { %v1450_v35 = vrot.slane %v2153_v59, %v1449_v25 }
0x1866   :  { %v1460_v60 = vrot.slane %v1450_v35, %v1445_v29 }
0x1923   :  { %v1527_v50 = vpop.f32.mrf.mxu0 }
0x1924   :  { %v1528_v45 = vadd.f32 %v1527_v50, %v1456_v36 }
0x1925   :  { %v1529_v51 = vpop.f32.mrf.mxu0 }
0x1926   :  { %v1530_v34 = vadd.f32 %v1529_v51, %v1460_v60  ;;  %v1532_v49 = vmax.f32 %v1528_v45, 0.0 }
0x1928   :  { %v1533_v57 = vmax.f32 %v1530_v34, 0.0 }
0x192a   :  { %1602 = vmatprep.mubr.f32.mxu1 %v1533_v57 }
0x192b   :  { %1603 = vmatmul.mubr.f32.vlgmr.msra.gmra.mxu1 %v1532_v49 }
0x19eb   :  { %v1791_v47 = vpop.f32.mrf.mxu1 }
0x19ed   :  { %v1792_v58 = vpop.f32.mrf.mxu1 }
0x19ee   :  { %v1793_v3 = vadd.f32 %v1792_v58, %v1791_v47 }
0x19f0   :  { %v1605_v4 = vadd.f32 %v1793_v3, %v1537_v2 }
0x19f2   :  { %1608 = vst [vmem:[#allocation5] sm:$0x3] %v1605_v4 }
0x19f3   :  { %2185 = shalt.err (!%p2182_p9)
}
0x19f4   :  { %1618 = dma.vmem_to_hbm [thread:$0]  %s1616_s27, 32, %s2941_s5, [#allocation4]  }
0x19f5   :  { %2196 = dma.done.wait [#allocation4], 32  }
0x19f6   :  { %2197 = vsyncadd [#allocation4], 4294967264 }
0x19f7   :  { %1622 = vsyncpa [#allocation3], 1 }
0x19f8   :  { %1623 = vsyncpa [#allocation4], 1 }

</bundles_post_ra>
